<compile_context>
chip_gen: v7x
topology: tpu7x:2x2x1
jax: 0.10.0
libtpu: 0.0.40
codegen_flags: <defaults>
</compile_context>

<pallas_src>
import jax
import jax.numpy as jnp
from jax import lax
from jax.experimental import pallas as pl
from jax.experimental.pallas import tpu as pltpu

# ---------------- small, forward-consistent hyper-parameters ----------------
BATCH = 2
INPUT_NC = 4          # input_nc
NDF = 8               # ndf
IMG_F = 32            # img_f
LAYERS = 4            # layers (>=4 so the i==2 Auto_Attn branch runs)
NUM_CLASSES = 5
SEQ_LEN = 64          # /2 per down block -> 4, conv_class(k=3, valid) -> 2
USE_ATTN = True
LEAKY_SLOPE = 0.1     # get_nonlinearity_layer('LeakyReLU') -> nn.LeakyReLU(0.1)
CIN_PAD = 8           # pad input channels 4 -> 8 (sublane-aligned stacking)
LANES = 128
NEG_INF = -1e30

F32 = jnp.float32


def _leaky(x):
    return jnp.where(x >= 0, x, LEAKY_SLOPE * x)


# ===================== host-side constant packing (1 DMA) ====================
def pack_constants(p):
    """Pack every weight, bias and precomputed mask into one (R, 128) f32 slab.

    Each block sits at an 8-aligned row offset; a conv block is [W_stacked | b]
    so weight and bias come from one contiguous row range.  Returns
    (slab, layout) with layout[name] = (row_off, rows, cols) — static Python
    ints consumed by the kernel at trace time.
    """
    entries = []  # (name, 2-D jnp array)

    def add(name, arr):
        arr = jnp.asarray(arr, F32)
        assert arr.ndim == 2 and arr.shape[1] <= LANES, (name, arr.shape)
        entries.append((name, arr))

    def stack_taps(w):  # (3, Cout, Cin) -> (Cout, 3*Cin), taps [x_{l-1}|x_l|x_{l+1}]
        return jnp.concatenate([w[0], w[1], w[2]], axis=1)

    def add_conv(name, w2d, b):
        add(name, jnp.concatenate([w2d, b], axis=1))  # bias in the last column

    def add_res(prefix, params, pad_cin=0):
        w1, b1, w2, b2, wb, bb = params
        if pad_cin:
            w1 = jnp.pad(w1, ((0, 0), (0, 0), (0, pad_cin)))
            wb = jnp.pad(wb, ((0, 0), (0, pad_cin)))
        add_conv(prefix + "_c1", stack_taps(w1), b1)
        add_conv(prefix + "_c2", stack_taps(w2), b2)
        add_conv(prefix + "_sc", wb, bb)

    add_res("b0", p["block0"], pad_cin=CIN_PAD - INPUT_NC)
    for i in range(LAYERS - 1):
        if i == 2 and USE_ATTN:
            wq, bq, gamma = p["attn2"]
            add_conv("attn_q", wq, bq)
            add("attn_g", gamma)
        add_res(f"e{i}", p[f"encoder{i}"])
    add_res("b1", p["block1_class"])
    wc, bc, wf, bf = p["head"]
    add_conv("head_c", stack_taps(wc), bc)
    add_conv("head_f", wf, bf)

    # --- precomputed masks / matrices (no iota/where inside the kernel) ------
    # AvgPool1d(2,2) matrix: pmat[r, c] = 0.5 iff r // 2 == c.  Smaller pools
    # are exactly its top-left slices, so one (128, 64) matrix serves all layers.
    rr = jnp.arange(LANES)[:, None] // 2
    cc = jnp.arange(LANES // 2)[None, :]
    add("pmat", jnp.where(rr == cc, 0.5, 0.0).astype(F32))

    # Conv seam masks per segment length: row 0 kills the x_{l-1} tap at the
    # left edge of every batch segment, row 1 kills x_{l+1} at the right edge.
    seg = SEQ_LEN
    for _ in range(LAYERS + 1):  # segs: 64, 32, 16, 8, 4
        nl = BATCH * seg
        pos = jnp.arange(nl) % seg
        m_prev = jnp.where(pos == 0, 0.0, 1.0)
        m_next = jnp.where(pos == seg - 1, 0.0, 1.0)
        add(f"seam_{seg}", jnp.stack([m_prev, m_next]).astype(F32))
        seg //= 2

    # Block-diagonal additive attention mask (attention runs at seg = SEQ_LEN//8).
    if USE_ATTN:
        seg_attn = SEQ_LEN // 8
        blk = jnp.arange(BATCH * seg_attn) // seg_attn
        add("attn_mask",
            jnp.where(blk[:, None] == blk[None, :], 0.0, NEG_INF).astype(F32))

    # --- lay blocks out at 8-aligned row offsets inside one (R, 128) slab ----
    layout, off = {}, 0
    for name, arr in entries:
        rows, cols = arr.shape
        layout[name] = (off, rows, cols)
        off += -(-rows // 8) * 8
    slab = jnp.zeros((off, LANES), F32)
    for name, arr in entries:
        o, rows, cols = layout[name]
        slab = slab.at[o:o + rows, :cols].set(arr)
    return slab, layout


# ================================ fused kernel ===============================
def make_kernel(layout):
    def get(c_ref, name):
        off, rows, cols = layout[name]
        return c_ref[off:off + rows, 0:cols]

    def get_wb(c_ref, name):
        off, rows, cols = layout[name]          # last column is the bias
        return (c_ref[off:off + rows, 0:cols - 1],
                c_ref[off:off + rows, cols - 1:cols])

    def conv3_same(c_ref, h, name, seg):
        """Conv1d(k=3, pad=1) on the batch-folded (Cin, N*L) slab."""
        w, b = get_wb(c_ref, name)
        soff, _, scols = layout[f"seam_{seg}"]
        m_prev = c_ref[soff:soff + 1, 0:scols]
        m_next = c_ref[soff + 1:soff + 2, 0:scols]
        nl = h.shape[1]
        hm = pltpu.roll(h, 1, 1) * m_prev        # x_{l-1}, zeroed at left seams
        hp = pltpu.roll(h, nl - 1, 1) * m_next   # x_{l+1}, zeroed at right seams
        hs = jnp.concatenate([hm, h, hp], axis=0)           # (3*Cin, N*L)
        return jnp.dot(w, hs, preferred_element_type=F32) + b

    def avgpool2(c_ref, h):
        nl = h.shape[1]
        off, _, _ = layout["pmat"]
        pmat = c_ref[off:off + nl, 0:nl // 2]
        return jnp.dot(h, pmat, preferred_element_type=F32)

    def resblock(c_ref, x, prefix, *, pre_act, pool, seg):
        h = _leaky(x) if pre_act else x
        h1 = _leaky(conv3_same(c_ref, h, prefix + "_c1", seg))
        h2 = conv3_same(c_ref, h1, prefix + "_c2", seg)
        wb, bb = get_wb(c_ref, prefix + "_sc")
        out = h2 + jnp.dot(wb, x, preferred_element_type=F32) + bb
        if pool:
            out = avgpool2(c_ref, out)
        return out

    def attention(c_ref, x):
        """Auto_Attn (self path); precomputed block-diagonal mask keeps batches apart."""
        wq, bq = get_wb(c_ref, "attn_q")
        gamma = get(c_ref, "attn_g")                      # (1, 1)
        amask = get(c_ref, "attn_mask")                   # (nl, nl) additive
        q = jnp.dot(wq, x, preferred_element_type=F32) + bq
        energy = lax.dot_general(q, q, (((0,), (0,)), ((), ())),
                                 preferred_element_type=F32) + amask
        energy = energy - jnp.max(energy, axis=-1, keepdims=True)
        e = jnp.exp(energy)
        attn = e * pl.reciprocal(jnp.sum(e, axis=-1, keepdims=True), approx=False)
        out = lax.dot_general(x, attn, (((1,), (1,)), ((), ())),
                              preferred_element_type=F32)  # V @ attn^T
        return gamma * out + x

    def head(c_ref, h, o_ref, seg):
        """LeakyReLU -> Conv1d(C,C,3) valid -> Conv1d(C,ncls,1): one slab pass, one store."""
        h = _leaky(h)
        nl = h.shape[1]
        lo = seg - 2
        # taps x_l, x_{l+1}, x_{l+2}; seam/wrap garbage lands only on dropped lanes.
        hs = jnp.concatenate(
            [h, pltpu.roll(h, nl - 1, 1), pltpu.roll(h, nl - 2, 1)], axis=0)
        wc, bc = get_wb(c_ref, "head_c")
        wf, bf = get_wb(c_ref, "head_f")
        hc = jnp.dot(wc, hs, preferred_element_type=F32) + bc
        logits = jnp.dot(wf, hc, preferred_element_type=F32) + bf      # (ncls, N*seg)
        valid = jnp.concatenate(
            [logits[:, b * seg:b * seg + lo] for b in range(BATCH)], axis=1)
        o_ref[...] = valid

    def kernel(x_ref, c_ref, o_ref):
        # Fold batch into lanes inside the kernel: (N, C, L) -> (CIN_PAD, N*L).
        h = jnp.concatenate([x_ref[b] for b in range(BATCH)], axis=1)
        h = jnp.concatenate(
            [h, jnp.zeros((CIN_PAD - INPUT_NC, BATCH * SEQ_LEN), F32)], axis=0)

        seg = SEQ_LEN
        h = resblock(c_ref, h, "b0", pre_act=False, pool=True, seg=seg)   # block0
        seg //= 2
        for i in range(LAYERS - 1):
            if i == 2 and USE_ATTN:
                h = attention(c_ref, h)              # attention map is discarded
            h = resblock(c_ref, h, f"e{i}", pre_act=True, pool=True, seg=seg)
            seg //= 2
        h = resblock(c_ref, h, "b1", pre_act=True, pool=False, seg=seg)   # block1_class
        head(c_ref, h, o_ref, seg)

    return kernel


# ============================== host-side wrapper ============================
def make_forward(layout):
    kernel = make_kernel(layout)
    lo = SEQ_LEN // (2 ** LAYERS) - 2

    def forward(x, consts):
        logits = pl.pallas_call(
            kernel,
            out_shape=jax.ShapeDtypeStruct((NUM_CLASSES, BATCH * lo), F32),
            compiler_params=pltpu.CompilerParams(
                vmem_limit_bytes=32 * 1024 * 1024),      # safe on v7x's 64 MiB VMEM
            cost_estimate=pl.CostEstimate(
                flops=1_100_000, transcendentals=300,
                bytes_accessed=(x.size + consts.size + NUM_CLASSES * BATCH * lo) * 4),
        )(x, consts)
        # unfold batch from lanes: (ncls, N*lo) -> (N, ncls, lo)
        return logits.reshape(NUM_CLASSES, BATCH, lo).transpose(1, 0, 2)

    return forward


# =========================== parameter init (synthetic) ======================
def init_params(key):
    keys = iter(jax.random.split(key, 64))

    def conv(c_out, c_in, k):
        kw, kb = jax.random.split(next(keys))
        w = jax.random.normal(kw, (k, c_out, c_in), F32) * 0.15   # (K, Cout, Cin)
        b = jax.random.normal(kb, (c_out, 1), F32) * 0.05
        return w, b

    def conv1x1(c_out, c_in):
        w, b = conv(c_out, c_in, 1)
        return w[0], b

    p = {}
    # block0: ResBlockEncoderOptimized(input_nc, ndf)
    w1, b1 = conv(NDF, INPUT_NC, 3)
    w2, b2 = conv(NDF, NDF, 3)
    wb, bb = conv1x1(NDF, INPUT_NC)
    p["block0"] = (w1, b1, w2, b2, wb, bb)

    mult = 1
    for i in range(LAYERS - 1):
        mult_prev = mult
        mult = min(2 ** (i + 1), IMG_F // NDF)
        cin, cout, chid = NDF * mult_prev, NDF * mult, NDF * mult_prev
        if i == 2 and USE_ATTN:
            wq, bq = conv1x1(cin // 4, cin)
            # PyTorch inits gamma to 0; nonzero so the attention path is exercised.
            gamma = jnp.full((1, 1), 0.1, F32)
            p["attn2"] = (wq, bq, gamma)
        w1, b1 = conv(chid, cin, 3)
        w2, b2 = conv(cout, chid, 3)
        wb, bb = conv1x1(cout, cin)
        p[f"encoder{i}"] = (w1, b1, w2, b2, wb, bb)

    cfin = NDF * mult
    w1, b1 = conv(cfin, cfin, 3)
    w2, b2 = conv(cfin, cfin, 3)
    wb, bb = conv1x1(cfin, cfin)
    p["block1_class"] = (w1, b1, w2, b2, wb, bb)

    wc, bc = conv(cfin, cfin, 3)            # conv_class: Conv1d(C, C, 3), no padding
    wf, bf = conv1x1(NUM_CLASSES, cfin)     # conv_final: Conv1d(C, num_classes, 1)
    p["head"] = (wc, bc, wf, bf)
    return p


# ============================ pure-JAX reference =============================
_HI = jax.lax.Precision.HIGHEST


def _ref_conv3_same(x, w, b):
    xp = jnp.pad(x, ((0, 0), (0, 0), (1, 1)))
    L = x.shape[-1]
    out = sum(jnp.einsum("oc,ncl->nol", w[k], xp[:, :, k:k + L], precision=_HI)
              for k in range(3))
    return out + b[None]


def _ref_resblock(x, p, pre_act, pool):
    w1, b1, w2, b2, wb, bb = p
    h = _leaky(x) if pre_act else x
    h1 = _leaky(_ref_conv3_same(h, w1, b1))
    h2 = _ref_conv3_same(h1, w2, b2)
    out = h2 + jnp.einsum("oc,ncl->nol", wb, x, precision=_HI) + bb[None]
    if pool:
        N, C, L = out.shape
        out = out.reshape(N, C, L // 2, 2).mean(-1)
    return out


def _ref_attn(x, wq, bq, gamma):
    q = jnp.einsum("oc,ncl->nol", wq, x, precision=_HI) + bq[None]
    energy = jnp.einsum("ncl,ncm->nlm", q, q, precision=_HI)
    energy = energy - energy.max(-1, keepdims=True)
    e = jnp.exp(energy)
    attn = e / e.sum(-1, keepdims=True)
    out = jnp.einsum("ncl,nml->ncm", x, attn, precision=_HI)
    return gamma[0, 0] * out + x


def _ref_head(x, wc, bc, wf, bf):
    h = _leaky(x)
    Lo = x.shape[-1] - 2
    hc = sum(jnp.einsum("oc,ncl->nol", wc[k], h[:, :, k:k + Lo], precision=_HI)
             for k in range(3)) + bc[None]
    return jnp.einsum("oc,ncl->nol", wf, hc, precision=_HI) + bf[None]


def ref_forward(x, p):
    out = _ref_resblock(x, p["block0"], False, True)
    for i in range(LAYERS - 1):
        if i == 2 and USE_ATTN:
            out = _ref_attn(out, *p["attn2"])
        out = _ref_resblock(out, p[f"encoder{i}"], True, True)
    out = _ref_resblock(out, p["block1_class"], True, False)
    return _ref_head(out, *p["head"])


# ================================== main =====================================
if __name__ == "__main__":
    key = jax.random.PRNGKey(0)
    kx, kp = jax.random.split(key)
    x = jax.random.normal(kx, (BATCH, INPUT_NC, SEQ_LEN), F32)
    params = init_params(kp)

    consts, layout = pack_constants(params)
    fwd = jax.jit(make_forward(layout))
    out = jax.block_until_ready(fwd(x, consts))

    expected_len = SEQ_LEN // (2 ** LAYERS) - 2   # block0 + (layers-1) downs, conv_class k=3 valid
    assert out.shape == (BATCH, NUM_CLASSES, expected_len), out.shape

    ref = ref_forward(x, params)
    ok = bool(jnp.all(jnp.isfinite(out))) and bool(
        jnp.allclose(out, ref, rtol=2e-2, atol=2e-2))
    if not ok:
        raise RuntimeError("Pallas output does not match JAX reference")
    print("KERNEL_OK")
</pallas_src>

<mosaic_0001>
module attributes {stable_mosaic.version = 11 : i64} {
  func.func @kernel(%arg0: memref<2x4x64xf32, #tpu.memory_space<vmem>>, %arg1: memref<576x128xf32, #tpu.memory_space<vmem>>, %arg2: memref<5x4xf32, #tpu.memory_space<vmem>>) attributes {dimension_semantics = [], scalar_prefetch = 0 : i64, scratch_operands = 0 : i64, tpu.core_type = #tpu.core_type<tc>} {
    %c0 = arith.constant 0 : index
    %c0_0 = arith.constant 0 : index
    %c0_1 = arith.constant 0 : index
    %0 = vector.load %arg0[%c0, %c0_0, %c0_1] : memref<2x4x64xf32, #tpu.memory_space<vmem>>, vector<1x4x64xf32>
    %1 = vector.shape_cast %0 : vector<1x4x64xf32> to vector<4x64xf32>
    %c1 = arith.constant 1 : index
    %c0_2 = arith.constant 0 : index
    %c0_3 = arith.constant 0 : index
    %2 = vector.load %arg0[%c1, %c0_2, %c0_3] : memref<2x4x64xf32, #tpu.memory_space<vmem>>, vector<1x4x64xf32>
    %3 = vector.shape_cast %2 : vector<1x4x64xf32> to vector<4x64xf32>
    %4 = tpu.concatenate %1, %3 in 1 : vector<4x64xf32>, vector<4x64xf32> -> vector<4x128xf32>
    %cst = arith.constant 0.000000e+00 : f32
    %5 = vector.broadcast %cst : f32 to vector<4x128xf32>
    %6 = tpu.concatenate %4, %5 in 0 : vector<4x128xf32>, vector<4x128xf32> -> vector<8x128xf32>
    %c0_4 = arith.constant 0 : index
    %c0_5 = arith.constant 0 : index
    %7 = vector.load %arg1[%c0_4, %c0_5] : memref<576x128xf32, #tpu.memory_space<vmem>>, vector<8x24xf32>
    %c0_6 = arith.constant 0 : index
    %c24 = arith.constant 24 : index
    %8 = vector.load %arg1[%c0_6, %c24] : memref<576x128xf32, #tpu.memory_space<vmem>>, vector<8x1xf32>
    %c520 = arith.constant 520 : index
    %c0_7 = arith.constant 0 : index
    %9 = vector.load %arg1[%c520, %c0_7] : memref<576x128xf32, #tpu.memory_space<vmem>>, vector<1x128xf32>
    %c521 = arith.constant 521 : index
    %c0_8 = arith.constant 0 : index
    %10 = vector.load %arg1[%c521, %c0_8] : memref<576x128xf32, #tpu.memory_space<vmem>>, vector<1x128xf32>
    %c1_i32 = arith.constant 1 : i32
    %11 = tpu.dynamic_rotate %6 by %c1_i32 dim 1 : vector<8x128xf32>, i32 -> vector<8x128xf32>
    %12 = vector.broadcast %9 : vector<1x128xf32> to vector<8x128xf32>
    %13 = arith.mulf %11, %12 : vector<8x128xf32>
    %c127_i32 = arith.constant 127 : i32
    %14 = tpu.dynamic_rotate %6 by %c127_i32 dim 1 : vector<8x128xf32>, i32 -> vector<8x128xf32>
    %15 = vector.broadcast %10 : vector<1x128xf32> to vector<8x128xf32>
    %16 = arith.mulf %14, %15 : vector<8x128xf32>
    %17 = tpu.concatenate %13, %6, %16 in 0 : vector<8x128xf32>, vector<8x128xf32>, vector<8x128xf32> -> vector<24x128xf32>
    %cst_9 = arith.constant dense<0.000000e+00> : vector<8x128xf32>
    %18 = tpu.matmul %7, %17, %cst_9 {dimension_numbers = #tpu.dot_dimension_numbers<[1], [0], [0], [1], [0, 0, 1, 1], [], []>} : vector<8x24xf32>, vector<24x128xf32>, vector<8x128xf32> -> vector<8x128xf32>
    %19 = vector.broadcast %8 : vector<8x1xf32> to vector<8x128xf32>
    %20 = arith.addf %18, %19 : vector<8x128xf32>
    %cst_10 = arith.constant 0.000000e+00 : f32
    %21 = vector.broadcast %cst_10 : f32 to vector<8x128xf32>
    %22 = arith.cmpf oge, %20, %21 : vector<8x128xf32>
    %cst_11 = arith.constant 1.000000e-01 : f32
    %23 = vector.broadcast %cst_11 : f32 to vector<8x128xf32>
    %24 = arith.mulf %23, %20 : vector<8x128xf32>
    %25 = arith.select %22, %20, %24 : vector<8x128xi1>, vector<8x128xf32>
    %c8 = arith.constant 8 : index
    %c0_12 = arith.constant 0 : index
    %26 = vector.load %arg1[%c8, %c0_12] : memref<576x128xf32, #tpu.memory_space<vmem>>, vector<8x24xf32>
    %c8_13 = arith.constant 8 : index
    %c24_14 = arith.constant 24 : index
    %27 = vector.load %arg1[%c8_13, %c24_14] : memref<576x128xf32, #tpu.memory_space<vmem>>, vector<8x1xf32>
    %c520_15 = arith.constant 520 : index
    %c0_16 = arith.constant 0 : index
    %28 = vector.load %arg1[%c520_15, %c0_16] : memref<576x128xf32, #tpu.memory_space<vmem>>, vector<1x128xf32>
    %c521_17 = arith.constant 521 : index
    %c0_18 = arith.constant 0 : index
    %29 = vector.load %arg1[%c521_17, %c0_18] : memref<576x128xf32, #tpu.memory_space<vmem>>, vector<1x128xf32>
    %c1_i32_19 = arith.constant 1 : i32
    %30 = tpu.dynamic_rotate %25 by %c1_i32_19 dim 1 : vector<8x128xf32>, i32 -> vector<8x128xf32>
    %31 = vector.broadcast %28 : vector<1x128xf32> to vector<8x128xf32>
    %32 = arith.mulf %30, %31 : vector<8x128xf32>
    %c127_i32_20 = arith.constant 127 : i32
    %33 = tpu.dynamic_rotate %25 by %c127_i32_20 dim 1 : vector<8x128xf32>, i32 -> vector<8x128xf32>
    %34 = vector.broadcast %29 : vector<1x128xf32> to vector<8x128xf32>
    %35 = arith.mulf %33, %34 : vector<8x128xf32>
    %36 = tpu.concatenate %32, %25, %35 in 0 : vector<8x128xf32>, vector<8x128xf32>, vector<8x128xf32> -> vector<24x128xf32>
    %cst_21 = arith.constant dense<0.000000e+00> : vector<8x128xf32>
    %37 = tpu.matmul %26, %36, %cst_21 {dimension_numbers = #tpu.dot_dimension_numbers<[1], [0], [0], [1], [0, 0, 1, 1], [], []>} : vector<8x24xf32>, vector<24x128xf32>, vector<8x128xf32> -> vector<8x128xf32>
    %38 = vector.broadcast %27 : vector<8x1xf32> to vector<8x128xf32>
    %39 = arith.addf %37, %38 : vector<8x128xf32>
    %c16 = arith.constant 16 : index
    %c0_22 = arith.constant 0 : index
    %40 = vector.load %arg1[%c16, %c0_22] : memref<576x128xf32, #tpu.memory_space<vmem>>, vector<8x8xf32>
    %c16_23 = arith.constant 16 : index
    %c8_24 = arith.constant 8 : index
    %41 = vector.load %arg1[%c16_23, %c8_24] : memref<576x128xf32, #tpu.memory_space<vmem>>, vector<8x1xf32>
    %cst_25 = arith.constant dense<0.000000e+00> : vector<8x128xf32>
    %42 = tpu.matmul %40, %6, %cst_25 {dimension_numbers = #tpu.dot_dimension_numbers<[1], [0], [0], [1], [0, 0, 1, 1], [], []>} : vector<8x8xf32>, vector<8x128xf32>, vector<8x128xf32> -> vector<8x128xf32>
    %43 = arith.addf %39, %42 : vector<8x128xf32>
    %44 = vector.broadcast %41 : vector<8x1xf32> to vector<8x128xf32>
    %45 = arith.addf %43, %44 : vector<8x128xf32>
    %c392 = arith.constant 392 : index
    %c0_26 = arith.constant 0 : index
    %46 = vector.load %arg1[%c392, %c0_26] : memref<576x128xf32, #tpu.memory_space<vmem>>, vector<128x64xf32>
    %cst_27 = arith.constant dense<0.000000e+00> : vector<8x64xf32>
    %47 = tpu.matmul %45, %46, %cst_27 {dimension_numbers = #tpu.dot_dimension_numbers<[1], [0], [0], [1], [0, 0, 1, 1], [], []>} : vector<8x128xf32>, vector<128x64xf32>, vector<8x64xf32> -> vector<8x64xf32>
    %cst_28 = arith.constant 0.000000e+00 : f32
    %48 = vector.broadcast %cst_28 : f32 to vector<8x64xf32>
    %49 = arith.cmpf oge, %47, %48 : vector<8x64xf32>
    %cst_29 = arith.constant 1.000000e-01 : f32
    %50 = vector.broadcast %cst_29 : f32 to vector<8x64xf32>
    %51 = arith.mulf %50, %47 : vector<8x64xf32>
    %52 = arith.select %49, %47, %51 : vector<8x64xi1>, vector<8x64xf32>
    %c24_30 = arith.constant 24 : index
    %c0_31 = arith.constant 0 : index
    %53 = vector.load %arg1[%c24_30, %c0_31] : memref<576x128xf32, #tpu.memory_space<vmem>>, vector<8x24xf32>
    %c24_32 = arith.constant 24 : index
    %c24_33 = arith.constant 24 : index
    %54 = vector.load %arg1[%c24_32, %c24_33] : memref<576x128xf32, #tpu.memory_space<vmem>>, vector<8x1xf32>
    %c528 = arith.constant 528 : index
    %c0_34 = arith.constant 0 : index
    %55 = vector.load %arg1[%c528, %c0_34] : memref<576x128xf32, #tpu.memory_space<vmem>>, vector<1x64xf32>
    %c529 = arith.constant 529 : index
    %c0_35 = arith.constant 0 : index
    %56 = vector.load %arg1[%c529, %c0_35] : memref<576x128xf32, #tpu.memory_space<vmem>>, vector<1x64xf32>
    %c1_i32_36 = arith.constant 1 : i32
    %57 = tpu.dynamic_rotate %52 by %c1_i32_36 dim 1 : vector<8x64xf32>, i32 -> vector<8x64xf32>
    %58 = vector.broadcast %55 : vector<1x64xf32> to vector<8x64xf32>
    %59 = arith.mulf %57, %58 : vector<8x64xf32>
    %c63_i32 = arith.constant 63 : i32
    %60 = tpu.dynamic_rotate %52 by %c63_i32 dim 1 : vector<8x64xf32>, i32 -> vector<8x64xf32>
    %61 = vector.broadcast %56 : vector<1x64xf32> to vector<8x64xf32>
    %62 = arith.mulf %60, %61 : vector<8x64xf32>
    %63 = tpu.concatenate %59, %52, %62 in 0 : vector<8x64xf32>, vector<8x64xf32>, vector<8x64xf32> -> vector<24x64xf32>
    %cst_37 = arith.constant dense<0.000000e+00> : vector<8x64xf32>
    %64 = tpu.matmul %53, %63, %cst_37 {dimension_numbers = #tpu.dot_dimension_numbers<[1], [0], [0], [1], [0, 0, 1, 1], [], []>} : vector<8x24xf32>, vector<24x64xf32>, vector<8x64xf32> -> vector<8x64xf32>
    %65 = vector.broadcast %54 : vector<8x1xf32> to vector<8x64xf32>
    %66 = arith.addf %64, %65 : vector<8x64xf32>
    %cst_38 = arith.constant 0.000000e+00 : f32
    %67 = vector.broadcast %cst_38 : f32 to vector<8x64xf32>
    %68 = arith.cmpf oge, %66, %67 : vector<8x64xf32>
    %cst_39 = arith.constant 1.000000e-01 : f32
    %69 = vector.broadcast %cst_39 : f32 to vector<8x64xf32>
    %70 = arith.mulf %69, %66 : vector<8x64xf32>
    %71 = arith.select %68, %66, %70 : vector<8x64xi1>, vector<8x64xf32>
    %c32 = arith.constant 32 : index
    %c0_40 = arith.constant 0 : index
    %72 = vector.load %arg1[%c32, %c0_40] : memref<576x128xf32, #tpu.memory_space<vmem>>, vector<16x24xf32>
    %c32_41 = arith.constant 32 : index
    %c24_42 = arith.constant 24 : index
    %73 = vector.load %arg1[%c32_41, %c24_42] : memref<576x128xf32, #tpu.memory_space<vmem>>, vector<16x1xf32>
    %c528_43 = arith.constant 528 : index
    %c0_44 = arith.constant 0 : index
    %74 = vector.load %arg1[%c528_43, %c0_44] : memref<576x128xf32, #tpu.memory_space<vmem>>, vector<1x64xf32>
    %c529_45 = arith.constant 529 : index
    %c0_46 = arith.constant 0 : index
    %75 = vector.load %arg1[%c529_45, %c0_46] : memref<576x128xf32, #tpu.memory_space<vmem>>, vector<1x64xf32>
    %c1_i32_47 = arith.constant 1 : i32
    %76 = tpu.dynamic_rotate %71 by %c1_i32_47 dim 1 : vector<8x64xf32>, i32 -> vector<8x64xf32>
    %77 = vector.broadcast %74 : vector<1x64xf32> to vector<8x64xf32>
    %78 = arith.mulf %76, %77 : vector<8x64xf32>
    %c63_i32_48 = arith.constant 63 : i32
    %79 = tpu.dynamic_rotate %71 by %c63_i32_48 dim 1 : vector<8x64xf32>, i32 -> vector<8x64xf32>
    %80 = vector.broadcast %75 : vector<1x64xf32> to vector<8x64xf32>
    %81 = arith.mulf %79, %80 : vector<8x64xf32>
    %82 = tpu.concatenate %78, %71, %81 in 0 : vector<8x64xf32>, vector<8x64xf32>, vector<8x64xf32> -> vector<24x64xf32>
    %cst_49 = arith.constant dense<0.000000e+00> : vector<16x64xf32>
    %83 = tpu.matmul %72, %82, %cst_49 {dimension_numbers = #tpu.dot_dimension_numbers<[1], [0], [0], [1], [0, 0, 1, 1], [], []>} : vector<16x24xf32>, vector<24x64xf32>, vector<16x64xf32> -> vector<16x64xf32>
    %84 = vector.broadcast %73 : vector<16x1xf32> to vector<16x64xf32>
    %85 = arith.addf %83, %84 : vector<16x64xf32>
    %c48 = arith.constant 48 : index
    %c0_50 = arith.constant 0 : index
    %86 = vector.load %arg1[%c48, %c0_50] : memref<576x128xf32, #tpu.memory_space<vmem>>, vector<16x8xf32>
    %c48_51 = arith.constant 48 : index
    %c8_52 = arith.constant 8 : index
    %87 = vector.load %arg1[%c48_51, %c8_52] : memref<576x128xf32, #tpu.memory_space<vmem>>, vector<16x1xf32>
    %cst_53 = arith.constant dense<0.000000e+00> : vector<16x64xf32>
    %88 = tpu.matmul %86, %47, %cst_53 {dimension_numbers = #tpu.dot_dimension_numbers<[1], [0], [0], [1], [0, 0, 1, 1], [], []>} : vector<16x8xf32>, vector<8x64xf32>, vector<16x64xf32> -> vector<16x64xf32>
    %89 = arith.addf %85, %88 : vector<16x64xf32>
    %90 = vector.broadcast %87 : vector<16x1xf32> to vector<16x64xf32>
    %91 = arith.addf %89, %90 : vector<16x64xf32>
    %c392_54 = arith.constant 392 : index
    %c0_55 = arith.constant 0 : index
    %92 = vector.load %arg1[%c392_54, %c0_55] : memref<576x128xf32, #tpu.memory_space<vmem>>, vector<64x32xf32>
    %cst_56 = arith.constant dense<0.000000e+00> : vector<16x32xf32>
    %93 = tpu.matmul %91, %92, %cst_56 {dimension_numbers = #tpu.dot_dimension_numbers<[1], [0], [0], [1], [0, 0, 1, 1], [], []>} : vector<16x64xf32>, vector<64x32xf32>, vector<16x32xf32> -> vector<16x32xf32>
    %cst_57 = arith.constant 0.000000e+00 : f32
    %94 = vector.broadcast %cst_57 : f32 to vector<16x32xf32>
    %95 = arith.cmpf oge, %93, %94 : vector<16x32xf32>
    %cst_58 = arith.constant 1.000000e-01 : f32
    %96 = vector.broadcast %cst_58 : f32 to vector<16x32xf32>
    %97 = arith.mulf %96, %93 : vector<16x32xf32>
    %98 = arith.select %95, %93, %97 : vector<16x32xi1>, vector<16x32xf32>
    %c64 = arith.constant 64 : index
    %c0_59 = arith.constant 0 : index
    %99 = vector.load %arg1[%c64, %c0_59] : memref<576x128xf32, #tpu.memory_space<vmem>>, vector<16x48xf32>
    %c64_60 = arith.constant 64 : index
    %c48_61 = arith.constant 48 : index
    %100 = vector.load %arg1[%c64_60, %c48_61] : memref<576x128xf32, #tpu.memory_space<vmem>>, vector<16x1xf32>
    %c536 = arith.constant 536 : index
    %c0_62 = arith.constant 0 : index
    %101 = vector.load %arg1[%c536, %c0_62] : memref<576x128xf32, #tpu.memory_space<vmem>>, vector<1x32xf32>
    %c537 = arith.constant 537 : index
    %c0_63 = arith.constant 0 : index
    %102 = vector.load %arg1[%c537, %c0_63] : memref<576x128xf32, #tpu.memory_space<vmem>>, vector<1x32xf32>
    %c1_i32_64 = arith.constant 1 : i32
    %103 = tpu.dynamic_rotate %98 by %c1_i32_64 dim 1 : vector<16x32xf32>, i32 -> vector<16x32xf32>
    %104 = vector.broadcast %101 : vector<1x32xf32> to vector<16x32xf32>
    %105 = arith.mulf %103, %104 : vector<16x32xf32>
    %c31_i32 = arith.constant 31 : i32
    %106 = tpu.dynamic_rotate %98 by %c31_i32 dim 1 : vector<16x32xf32>, i32 -> vector<16x32xf32>
    %107 = vector.broadcast %102 : vector<1x32xf32> to vector<16x32xf32>
    %108 = arith.mulf %106, %107 : vector<16x32xf32>
    %109 = tpu.concatenate %105, %98, %108 in 0 : vector<16x32xf32>, vector<16x32xf32>, vector<16x32xf32> -> vector<48x32xf32>
    %cst_65 = arith.constant dense<0.000000e+00> : vector<16x32xf32>
    %110 = tpu.matmul %99, %109, %cst_65 {dimension_numbers = #tpu.dot_dimension_numbers<[1], [0], [0], [1], [0, 0, 1, 1], [], []>} : vector<16x48xf32>, vector<48x32xf32>, vector<16x32xf32> -> vector<16x32xf32>
    %111 = vector.broadcast %100 : vector<16x1xf32> to vector<16x32xf32>
    %112 = arith.addf %110, %111 : vector<16x32xf32>
    %cst_66 = arith.constant 0.000000e+00 : f32
    %113 = vector.broadcast %cst_66 : f32 to vector<16x32xf32>
    %114 = arith.cmpf oge, %112, %113 : vector<16x32xf32>
    %cst_67 = arith.constant 1.000000e-01 : f32
    %115 = vector.broadcast %cst_67 : f32 to vector<16x32xf32>
    %116 = arith.mulf %115, %112 : vector<16x32xf32>
    %117 = arith.select %114, %112, %116 : vector<16x32xi1>, vector<16x32xf32>
    %c80 = arith.constant 80 : index
    %c0_68 = arith.constant 0 : index
    %118 = vector.load %arg1[%c80, %c0_68] : memref<576x128xf32, #tpu.memory_space<vmem>>, vector<32x48xf32>
    %c80_69 = arith.constant 80 : index
    %c48_70 = arith.constant 48 : index
    %119 = vector.load %arg1[%c80_69, %c48_70] : memref<576x128xf32, #tpu.memory_space<vmem>>, vector<32x1xf32>
    %c536_71 = arith.constant 536 : index
    %c0_72 = arith.constant 0 : index
    %120 = vector.load %arg1[%c536_71, %c0_72] : memref<576x128xf32, #tpu.memory_space<vmem>>, vector<1x32xf32>
    %c537_73 = arith.constant 537 : index
    %c0_74 = arith.constant 0 : index
    %121 = vector.load %arg1[%c537_73, %c0_74] : memref<576x128xf32, #tpu.memory_space<vmem>>, vector<1x32xf32>
    %c1_i32_75 = arith.constant 1 : i32
    %122 = tpu.dynamic_rotate %117 by %c1_i32_75 dim 1 : vector<16x32xf32>, i32 -> vector<16x32xf32>
    %123 = vector.broadcast %120 : vector<1x32xf32> to vector<16x32xf32>
    %124 = arith.mulf %122, %123 : vector<16x32xf32>
    %c31_i32_76 = arith.constant 31 : i32
    %125 = tpu.dynamic_rotate %117 by %c31_i32_76 dim 1 : vector<16x32xf32>, i32 -> vector<16x32xf32>
    %126 = vector.broadcast %121 : vector<1x32xf32> to vector<16x32xf32>
    %127 = arith.mulf %125, %126 : vector<16x32xf32>
    %128 = tpu.concatenate %124, %117, %127 in 0 : vector<16x32xf32>, vector<16x32xf32>, vector<16x32xf32> -> vector<48x32xf32>
    %cst_77 = arith.constant dense<0.000000e+00> : vector<32x32xf32>
    %129 = tpu.matmul %118, %128, %cst_77 {dimension_numbers = #tpu.dot_dimension_numbers<[1], [0], [0], [1], [0, 0, 1, 1], [], []>} : vector<32x48xf32>, vector<48x32xf32>, vector<32x32xf32> -> vector<32x32xf32>
    %130 = vector.broadcast %119 : vector<32x1xf32> to vector<32x32xf32>
    %131 = arith.addf %129, %130 : vector<32x32xf32>
    %c112 = arith.constant 112 : index
    %c0_78 = arith.constant 0 : index
    %132 = vector.load %arg1[%c112, %c0_78] : memref<576x128xf32, #tpu.memory_space<vmem>>, vector<32x16xf32>
    %c112_79 = arith.constant 112 : index
    %c16_80 = arith.constant 16 : index
    %133 = vector.load %arg1[%c112_79, %c16_80] : memref<576x128xf32, #tpu.memory_space<vmem>>, vector<32x1xf32>
    %cst_81 = arith.constant dense<0.000000e+00> : vector<32x32xf32>
    %134 = tpu.matmul %132, %93, %cst_81 {dimension_numbers = #tpu.dot_dimension_numbers<[1], [0], [0], [1], [0, 0, 1, 1], [], []>} : vector<32x16xf32>, vector<16x32xf32>, vector<32x32xf32> -> vector<32x32xf32>
    %135 = arith.addf %131, %134 : vector<32x32xf32>
    %136 = vector.broadcast %133 : vector<32x1xf32> to vector<32x32xf32>
    %137 = arith.addf %135, %136 : vector<32x32xf32>
    %c392_82 = arith.constant 392 : index
    %c0_83 = arith.constant 0 : index
    %138 = vector.load %arg1[%c392_82, %c0_83] : memref<576x128xf32, #tpu.memory_space<vmem>>, vector<32x16xf32>
    %cst_84 = arith.constant dense<0.000000e+00> : vector<32x16xf32>
    %139 = tpu.matmul %137, %138, %cst_84 {dimension_numbers = #tpu.dot_dimension_numbers<[1], [0], [0], [1], [0, 0, 1, 1], [], []>} : vector<32x32xf32>, vector<32x16xf32>, vector<32x16xf32> -> vector<32x16xf32>
    %c144 = arith.constant 144 : index
    %c0_85 = arith.constant 0 : index
    %140 = vector.load %arg1[%c144, %c0_85] : memref<576x128xf32, #tpu.memory_space<vmem>>, vector<8x32xf32>
    %c144_86 = arith.constant 144 : index
    %c32_87 = arith.constant 32 : index
    %141 = vector.load %arg1[%c144_86, %c32_87] : memref<576x128xf32, #tpu.memory_space<vmem>>, vector<8x1xf32>
    %c152 = arith.constant 152 : index
    %c0_88 = arith.constant 0 : index
    %142 = vector.load %arg1[%c152, %c0_88] : memref<576x128xf32, #tpu.memory_space<vmem>>, vector<1x1xf32>
    %c560 = arith.constant 560 : index
    %c0_89 = arith.constant 0 : index
    %143 = vector.load %arg1[%c560, %c0_89] : memref<576x128xf32, #tpu.memory_space<vmem>>, vector<16x16xf32>
    %cst_90 = arith.constant dense<0.000000e+00> : vector<8x16xf32>
    %144 = tpu.matmul %140, %139, %cst_90 {dimension_numbers = #tpu.dot_dimension_numbers<[1], [0], [0], [1], [0, 0, 1, 1], [], []>} : vector<8x32xf32>, vector<32x16xf32>, vector<8x16xf32> -> vector<8x16xf32>
    %145 = vector.broadcast %141 : vector<8x1xf32> to vector<8x16xf32>
    %146 = arith.addf %144, %145 : vector<8x16xf32>
    %cst_91 = arith.constant dense<0.000000e+00> : vector<16x16xf32>
    %147 = tpu.matmul %146, %146, %cst_91 {dimension_numbers = #tpu.dot_dimension_numbers<[0], [0], [1], [1], [0, 1, 1, 1], [], []>} : vector<8x16xf32>, vector<8x16xf32>, vector<16x16xf32> -> vector<16x16xf32>
    %148 = arith.addf %147, %143 : vector<16x16xf32>
    %cst_92 = arith.constant dense<0xFF800000> : vector<16xf32>
    %149 = vector.multi_reduction <maximumf>, %148, %cst_92 [1] : vector<16x16xf32> to vector<16xf32>
    %150 = vector.shape_cast %149 : vector<16xf32> to vector<16x1xf32>
    %151 = vector.broadcast %150 : vector<16x1xf32> to vector<16x16xf32>
    %152 = arith.subf %148, %151 : vector<16x16xf32>
    %153 = math.exp %152 : vector<16x16xf32>
    %cst_93 = arith.constant dense<0.000000e+00> : vector<16xf32>
    %154 = vector.multi_reduction <add>, %153, %cst_93 [1] : vector<16x16xf32> to vector<16xf32>
    %155 = vector.shape_cast %154 : vector<16xf32> to vector<16x1xf32>
    %156 = tpu.reciprocal %155 : vector<16x1xf32> -> vector<16x1xf32>
    %157 = vector.broadcast %156 : vector<16x1xf32> to vector<16x16xf32>
    %158 = arith.mulf %153, %157 : vector<16x16xf32>
    %cst_94 = arith.constant dense<0.000000e+00> : vector<32x16xf32>
    %159 = tpu.matmul %139, %158, %cst_94 {dimension_numbers = #tpu.dot_dimension_numbers<[1], [1], [0], [0], [0, 0, 1, 0], [], []>} : vector<32x16xf32>, vector<16x16xf32>, vector<32x16xf32> -> vector<32x16xf32>
    %160 = vector.broadcast %142 : vector<1x1xf32> to vector<32x16xf32>
    %161 = arith.mulf %160, %159 : vector<32x16xf32>
    %162 = arith.addf %161, %139 : vector<32x16xf32>
    %cst_95 = arith.constant 0.000000e+00 : f32
    %163 = vector.broadcast %cst_95 : f32 to vector<32x16xf32>
    %164 = arith.cmpf oge, %162, %163 : vector<32x16xf32>
    %cst_96 = arith.constant 1.000000e-01 : f32
    %165 = vector.broadcast %cst_96 : f32 to vector<32x16xf32>
    %166 = arith.mulf %165, %162 : vector<32x16xf32>
    %167 = arith.select %164, %162, %166 : vector<32x16xi1>, vector<32x16xf32>
    %c160 = arith.constant 160 : index
    %c0_97 = arith.constant 0 : index
    %168 = vector.load %arg1[%c160, %c0_97] : memref<576x128xf32, #tpu.memory_space<vmem>>, vector<32x96xf32>
    %c160_98 = arith.constant 160 : index
    %c96 = arith.constant 96 : index
    %169 = vector.load %arg1[%c160_98, %c96] : memref<576x128xf32, #tpu.memory_space<vmem>>, vector<32x1xf32>
    %c544 = arith.constant 544 : index
    %c0_99 = arith.constant 0 : index
    %170 = vector.load %arg1[%c544, %c0_99] : memref<576x128xf32, #tpu.memory_space<vmem>>, vector<1x16xf32>
    %c545 = arith.constant 545 : index
    %c0_100 = arith.constant 0 : index
    %171 = vector.load %arg1[%c545, %c0_100] : memref<576x128xf32, #tpu.memory_space<vmem>>, vector<1x16xf32>
    %c1_i32_101 = arith.constant 1 : i32
    %172 = tpu.dynamic_rotate %167 by %c1_i32_101 dim 1 : vector<32x16xf32>, i32 -> vector<32x16xf32>
    %173 = vector.broadcast %170 : vector<1x16xf32> to vector<32x16xf32>
    %174 = arith.mulf %172, %173 : vector<32x16xf32>
    %c15_i32 = arith.constant 15 : i32
    %175 = tpu.dynamic_rotate %167 by %c15_i32 dim 1 : vector<32x16xf32>, i32 -> vector<32x16xf32>
    %176 = vector.broadcast %171 : vector<1x16xf32> to vector<32x16xf32>
    %177 = arith.mulf %175, %176 : vector<32x16xf32>
    %178 = tpu.concatenate %174, %167, %177 in 0 : vector<32x16xf32>, vector<32x16xf32>, vector<32x16xf32> -> vector<96x16xf32>
    %cst_102 = arith.constant dense<0.000000e+00> : vector<32x16xf32>
    %179 = tpu.matmul %168, %178, %cst_102 {dimension_numbers = #tpu.dot_dimension_numbers<[1], [0], [0], [1], [0, 0, 1, 1], [], []>} : vector<32x96xf32>, vector<96x16xf32>, vector<32x16xf32> -> vector<32x16xf32>
    %180 = vector.broadcast %169 : vector<32x1xf32> to vector<32x16xf32>
    %181 = arith.addf %179, %180 : vector<32x16xf32>
    %cst_103 = arith.constant 0.000000e+00 : f32
    %182 = vector.broadcast %cst_103 : f32 to vector<32x16xf32>
    %183 = arith.cmpf oge, %181, %182 : vector<32x16xf32>
    %cst_104 = arith.constant 1.000000e-01 : f32
    %184 = vector.broadcast %cst_104 : f32 to vector<32x16xf32>
    %185 = arith.mulf %184, %181 : vector<32x16xf32>
    %186 = arith.select %183, %181, %185 : vector<32x16xi1>, vector<32x16xf32>
    %c192 = arith.constant 192 : index
    %c0_105 = arith.constant 0 : index
    %187 = vector.load %arg1[%c192, %c0_105] : memref<576x128xf32, #tpu.memory_space<vmem>>, vector<32x96xf32>
    %c192_106 = arith.constant 192 : index
    %c96_107 = arith.constant 96 : index
    %188 = vector.load %arg1[%c192_106, %c96_107] : memref<576x128xf32, #tpu.memory_space<vmem>>, vector<32x1xf32>
    %c544_108 = arith.constant 544 : index
    %c0_109 = arith.constant 0 : index
    %189 = vector.load %arg1[%c544_108, %c0_109] : memref<576x128xf32, #tpu.memory_space<vmem>>, vector<1x16xf32>
    %c545_110 = arith.constant 545 : index
    %c0_111 = arith.constant 0 : index
    %190 = vector.load %arg1[%c545_110, %c0_111] : memref<576x128xf32, #tpu.memory_space<vmem>>, vector<1x16xf32>
    %c1_i32_112 = arith.constant 1 : i32
    %191 = tpu.dynamic_rotate %186 by %c1_i32_112 dim 1 : vector<32x16xf32>, i32 -> vector<32x16xf32>
    %192 = vector.broadcast %189 : vector<1x16xf32> to vector<32x16xf32>
    %193 = arith.mulf %191, %192 : vector<32x16xf32>
    %c15_i32_113 = arith.constant 15 : i32
    %194 = tpu.dynamic_rotate %186 by %c15_i32_113 dim 1 : vector<32x16xf32>, i32 -> vector<32x16xf32>
    %195 = vector.broadcast %190 : vector<1x16xf32> to vector<32x16xf32>
    %196 = arith.mulf %194, %195 : vector<32x16xf32>
    %197 = tpu.concatenate %193, %186, %196 in 0 : vector<32x16xf32>, vector<32x16xf32>, vector<32x16xf32> -> vector<96x16xf32>
    %cst_114 = arith.constant dense<0.000000e+00> : vector<32x16xf32>
    %198 = tpu.matmul %187, %197, %cst_114 {dimension_numbers = #tpu.dot_dimension_numbers<[1], [0], [0], [1], [0, 0, 1, 1], [], []>} : vector<32x96xf32>, vector<96x16xf32>, vector<32x16xf32> -> vector<32x16xf32>
    %199 = vector.broadcast %188 : vector<32x1xf32> to vector<32x16xf32>
    %200 = arith.addf %198, %199 : vector<32x16xf32>
    %c224 = arith.constant 224 : index
    %c0_115 = arith.constant 0 : index
    %201 = vector.load %arg1[%c224, %c0_115] : memref<576x128xf32, #tpu.memory_space<vmem>>, vector<32x32xf32>
    %c224_116 = arith.constant 224 : index
    %c32_117 = arith.constant 32 : index
    %202 = vector.load %arg1[%c224_116, %c32_117] : memref<576x128xf32, #tpu.memory_space<vmem>>, vector<32x1xf32>
    %cst_118 = arith.constant dense<0.000000e+00> : vector<32x16xf32>
    %203 = tpu.matmul %201, %162, %cst_118 {dimension_numbers = #tpu.dot_dimension_numbers<[1], [0], [0], [1], [0, 0, 1, 1], [], []>} : vector<32x32xf32>, vector<32x16xf32>, vector<32x16xf32> -> vector<32x16xf32>
    %204 = arith.addf %200, %203 : vector<32x16xf32>
    %205 = vector.broadcast %202 : vector<32x1xf32> to vector<32x16xf32>
    %206 = arith.addf %204, %205 : vector<32x16xf32>
    %c392_119 = arith.constant 392 : index
    %c0_120 = arith.constant 0 : index
    %207 = vector.load %arg1[%c392_119, %c0_120] : memref<576x128xf32, #tpu.memory_space<vmem>>, vector<16x8xf32>
    %cst_121 = arith.constant dense<0.000000e+00> : vector<32x8xf32>
    %208 = tpu.matmul %206, %207, %cst_121 {dimension_numbers = #tpu.dot_dimension_numbers<[1], [0], [0], [1], [0, 0, 1, 1], [], []>} : vector<32x16xf32>, vector<16x8xf32>, vector<32x8xf32> -> vector<32x8xf32>
    %cst_122 = arith.constant 0.000000e+00 : f32
    %209 = vector.broadcast %cst_122 : f32 to vector<32x8xf32>
    %210 = arith.cmpf oge, %208, %209 : vector<32x8xf32>
    %cst_123 = arith.constant 1.000000e-01 : f32
    %211 = vector.broadcast %cst_123 : f32 to vector<32x8xf32>
    %212 = arith.mulf %211, %208 : vector<32x8xf32>
    %213 = arith.select %210, %208, %212 : vector<32x8xi1>, vector<32x8xf32>
    %c256 = arith.constant 256 : index
    %c0_124 = arith.constant 0 : index
    %214 = vector.load %arg1[%c256, %c0_124] : memref<576x128xf32, #tpu.memory_space<vmem>>, vector<32x96xf32>
    %c256_125 = arith.constant 256 : index
    %c96_126 = arith.constant 96 : index
    %215 = vector.load %arg1[%c256_125, %c96_126] : memref<576x128xf32, #tpu.memory_space<vmem>>, vector<32x1xf32>
    %c552 = arith.constant 552 : index
    %c0_127 = arith.constant 0 : index
    %216 = vector.load %arg1[%c552, %c0_127] : memref<576x128xf32, #tpu.memory_space<vmem>>, vector<1x8xf32>
    %c553 = arith.constant 553 : index
    %c0_128 = arith.constant 0 : index
    %217 = vector.load %arg1[%c553, %c0_128] : memref<576x128xf32, #tpu.memory_space<vmem>>, vector<1x8xf32>
    %c1_i32_129 = arith.constant 1 : i32
    %218 = tpu.dynamic_rotate %213 by %c1_i32_129 dim 1 : vector<32x8xf32>, i32 -> vector<32x8xf32>
    %219 = vector.broadcast %216 : vector<1x8xf32> to vector<32x8xf32>
    %220 = arith.mulf %218, %219 : vector<32x8xf32>
    %c7_i32 = arith.constant 7 : i32
    %221 = tpu.dynamic_rotate %213 by %c7_i32 dim 1 : vector<32x8xf32>, i32 -> vector<32x8xf32>
    %222 = vector.broadcast %217 : vector<1x8xf32> to vector<32x8xf32>
    %223 = arith.mulf %221, %222 : vector<32x8xf32>
    %224 = tpu.concatenate %220, %213, %223 in 0 : vector<32x8xf32>, vector<32x8xf32>, vector<32x8xf32> -> vector<96x8xf32>
    %cst_130 = arith.constant dense<0.000000e+00> : vector<32x8xf32>
    %225 = tpu.matmul %214, %224, %cst_130 {dimension_numbers = #tpu.dot_dimension_numbers<[1], [0], [0], [1], [0, 0, 1, 1], [], []>} : vector<32x96xf32>, vector<96x8xf32>, vector<32x8xf32> -> vector<32x8xf32>
    %226 = vector.broadcast %215 : vector<32x1xf32> to vector<32x8xf32>
    %227 = arith.addf %225, %226 : vector<32x8xf32>
    %cst_131 = arith.constant 0.000000e+00 : f32
    %228 = vector.broadcast %cst_131 : f32 to vector<32x8xf32>
    %229 = arith.cmpf oge, %227, %228 : vector<32x8xf32>
    %cst_132 = arith.constant 1.000000e-01 : f32
    %230 = vector.broadcast %cst_132 : f32 to vector<32x8xf32>
    %231 = arith.mulf %230, %227 : vector<32x8xf32>
    %232 = arith.select %229, %227, %231 : vector<32x8xi1>, vector<32x8xf32>
    %c288 = arith.constant 288 : index
    %c0_133 = arith.constant 0 : index
    %233 = vector.load %arg1[%c288, %c0_133] : memref<576x128xf32, #tpu.memory_space<vmem>>, vector<32x96xf32>
    %c288_134 = arith.constant 288 : index
    %c96_135 = arith.constant 96 : index
    %234 = vector.load %arg1[%c288_134, %c96_135] : memref<576x128xf32, #tpu.memory_space<vmem>>, vector<32x1xf32>
    %c552_136 = arith.constant 552 : index
    %c0_137 = arith.constant 0 : index
    %235 = vector.load %arg1[%c552_136, %c0_137] : memref<576x128xf32, #tpu.memory_space<vmem>>, vector<1x8xf32>
    %c553_138 = arith.constant 553 : index
    %c0_139 = arith.constant 0 : index
    %236 = vector.load %arg1[%c553_138, %c0_139] : memref<576x128xf32, #tpu.memory_space<vmem>>, vector<1x8xf32>
    %c1_i32_140 = arith.constant 1 : i32
    %237 = tpu.dynamic_rotate %232 by %c1_i32_140 dim 1 : vector<32x8xf32>, i32 -> vector<32x8xf32>
    %238 = vector.broadcast %235 : vector<1x8xf32> to vector<32x8xf32>
    %239 = arith.mulf %237, %238 : vector<32x8xf32>
    %c7_i32_141 = arith.constant 7 : i32
    %240 = tpu.dynamic_rotate %232 by %c7_i32_141 dim 1 : vector<32x8xf32>, i32 -> vector<32x8xf32>
    %241 = vector.broadcast %236 : vector<1x8xf32> to vector<32x8xf32>
    %242 = arith.mulf %240, %241 : vector<32x8xf32>
    %243 = tpu.concatenate %239, %232, %242 in 0 : vector<32x8xf32>, vector<32x8xf32>, vector<32x8xf32> -> vector<96x8xf32>
    %cst_142 = arith.constant dense<0.000000e+00> : vector<32x8xf32>
    %244 = tpu.matmul %233, %243, %cst_142 {dimension_numbers = #tpu.dot_dimension_numbers<[1], [0], [0], [1], [0, 0, 1, 1], [], []>} : vector<32x96xf32>, vector<96x8xf32>, vector<32x8xf32> -> vector<32x8xf32>
    %245 = vector.broadcast %234 : vector<32x1xf32> to vector<32x8xf32>
    %246 = arith.addf %244, %245 : vector<32x8xf32>
    %c320 = arith.constant 320 : index
    %c0_143 = arith.constant 0 : index
    %247 = vector.load %arg1[%c320, %c0_143] : memref<576x128xf32, #tpu.memory_space<vmem>>, vector<32x32xf32>
    %c320_144 = arith.constant 320 : index
    %c32_145 = arith.constant 32 : index
    %248 = vector.load %arg1[%c320_144, %c32_145] : memref<576x128xf32, #tpu.memory_space<vmem>>, vector<32x1xf32>
    %cst_146 = arith.constant dense<0.000000e+00> : vector<32x8xf32>
    %249 = tpu.matmul %247, %208, %cst_146 {dimension_numbers = #tpu.dot_dimension_numbers<[1], [0], [0], [1], [0, 0, 1, 1], [], []>} : vector<32x32xf32>, vector<32x8xf32>, vector<32x8xf32> -> vector<32x8xf32>
    %250 = arith.addf %246, %249 : vector<32x8xf32>
    %251 = vector.broadcast %248 : vector<32x1xf32> to vector<32x8xf32>
    %252 = arith.addf %250, %251 : vector<32x8xf32>
    %cst_147 = arith.constant 0.000000e+00 : f32
    %253 = vector.broadcast %cst_147 : f32 to vector<32x8xf32>
    %254 = arith.cmpf oge, %252, %253 : vector<32x8xf32>
    %cst_148 = arith.constant 1.000000e-01 : f32
    %255 = vector.broadcast %cst_148 : f32 to vector<32x8xf32>
    %256 = arith.mulf %255, %252 : vector<32x8xf32>
    %257 = arith.select %254, %252, %256 : vector<32x8xi1>, vector<32x8xf32>
    %c7_i32_149 = arith.constant 7 : i32
    %258 = tpu.dynamic_rotate %257 by %c7_i32_149 dim 1 : vector<32x8xf32>, i32 -> vector<32x8xf32>
    %c6_i32 = arith.constant 6 : i32
    %259 = tpu.dynamic_rotate %257 by %c6_i32 dim 1 : vector<32x8xf32>, i32 -> vector<32x8xf32>
    %260 = tpu.concatenate %257, %258, %259 in 0 : vector<32x8xf32>, vector<32x8xf32>, vector<32x8xf32> -> vector<96x8xf32>
    %c352 = arith.constant 352 : index
    %c0_150 = arith.constant 0 : index
    %261 = vector.load %arg1[%c352, %c0_150] : memref<576x128xf32, #tpu.memory_space<vmem>>, vector<32x96xf32>
    %c352_151 = arith.constant 352 : index
    %c96_152 = arith.constant 96 : index
    %262 = vector.load %arg1[%c352_151, %c96_152] : memref<576x128xf32, #tpu.memory_space<vmem>>, vector<32x1xf32>
    %c384 = arith.constant 384 : index
    %c0_153 = arith.constant 0 : index
    %263 = vector.load %arg1[%c384, %c0_153] : memref<576x128xf32, #tpu.memory_space<vmem>>, vector<5x32xf32>
    %c384_154 = arith.constant 384 : index
    %c32_155 = arith.constant 32 : index
    %264 = vector.load %arg1[%c384_154, %c32_155] : memref<576x128xf32, #tpu.memory_space<vmem>>, vector<5x1xf32>
    %cst_156 = arith.constant dense<0.000000e+00> : vector<32x8xf32>
    %265 = tpu.matmul %261, %260, %cst_156 {dimension_numbers = #tpu.dot_dimension_numbers<[1], [0], [0], [1], [0, 0, 1, 1], [], []>} : vector<32x96xf32>, vector<96x8xf32>, vector<32x8xf32> -> vector<32x8xf32>
    %266 = vector.broadcast %262 : vector<32x1xf32> to vector<32x8xf32>
    %267 = arith.addf %265, %266 : vector<32x8xf32>
    %cst_157 = arith.constant dense<0.000000e+00> : vector<5x8xf32>
    %268 = tpu.matmul %263, %267, %cst_157 {dimension_numbers = #tpu.dot_dimension_numbers<[1], [0], [0], [1], [0, 0, 1, 1], [], []>} : vector<5x32xf32>, vector<32x8xf32>, vector<5x8xf32> -> vector<5x8xf32>
    %269 = vector.broadcast %264 : vector<5x1xf32> to vector<5x8xf32>
    %270 = arith.addf %268, %269 : vector<5x8xf32>
    %271 = vector.extract_strided_slice %270 {offsets = [0, 0], sizes = [5, 2], strides = [1, 1]} : vector<5x8xf32> to vector<5x2xf32>
    %272 = vector.extract_strided_slice %270 {offsets = [0, 4], sizes = [5, 2], strides = [1, 1]} : vector<5x8xf32> to vector<5x2xf32>
    %273 = tpu.concatenate %271, %272 in 1 : vector<5x2xf32>, vector<5x2xf32> -> vector<5x4xf32>
    %c0_158 = arith.constant 0 : index
    %c0_159 = arith.constant 0 : index
    %274 = vector.load %arg2[%c0_158, %c0_159] : memref<5x4xf32, #tpu.memory_space<vmem>>, vector<5x4xf32>
    tpu.vector_store %arg2[%c0_158, %c0_159], %273 {strides = array<i32>} : memref<5x4xf32, #tpu.memory_space<vmem>>, vector<5x4xf32>,
    return
  }
}

</mosaic_0001>

<bundles_post_ra>
// kernel: forward.1
= control target key start
LH: loop header
LB: loop body
LE: loop exit
PB: predicated region body
PF: predicated region fallthrough
CT: control target
= control target key end

     0   :  { %7 = vsyncpa [#allocation3], 0  ;;  %s5148_s0 = inlined_call_operand.hbm [shape: f32[2,4,64], index: 0, kind: input, shape index: {}]   ;;  %s5149_s1 = inlined_call_operand.hbm [shape: f32[576,128], index: 1, kind: input, shape index: {}]   ;;  %s5150_s2 = inlined_call_operand.vmem [shape: f32[5,4], index: 2, kind: output, shape index: {}]  }
   0x1   :  { %8 = vsyncpa [#allocation5], 0  ;;  %s4640_s9 = smov [#allocation2]   ;;  %s4592_s13 = scalar_lea.hbm %s5148_s0, 128 }
   0x2   :  { %s14_s10 = sshll.u32 %s4640_s9, 4  ;;  %p4593_p0 = scmp.ne.s32.totalorder %s5148_s0, %s4592_s13  ;;  %s15_s10 = int_to_ptr.vmem [resolvable:$true] %s14_s10 }
   0x3   :  { %p4596_p1 = scmp.lt.u32.totalorder %s4592_s13, %s5148_s0 }
   0x5   :  { %p4598_p2 = pnand %p4596_p1, %p4593_p0 }
   0x7   :  { %4601 = shalt.err (!%p4598_p2)
}
   0x8   :  { %s4602_s18 = scalar_lea.vmem %s15_s10, 128  ;;  %p4607_p4 = scmp.lt.s32.totalorder %s15_s10, %s15_s10 }
   0x9   :  { %p4603_p3 = scmp.ne.s32.totalorder %s15_s10, %s4602_s18  ;;  %p4608_p5 = scmp.lt.s32.totalorder %s4602_s18, %s4602_s18 }
   0xb   :  { %p4609_p6 = por %p4608_p5, %p4607_p4 }
   0xd   :  { %p4610_p7 = pnand %p4609_p6, %p4603_p3 }
   0xf   :  { %4613 = shalt.err (!%p4610_p7)
}
  0x10   :  { %s4641_s19 = smov 64   ;;  %s4642_s20 = smov 4  }
  0x11   :  { %20 = dma.hbm_to_vmem [thread:$0]  %s5148_s0, 128, %s15_s10, [#allocation3], %s4641_s19, %s4641_s19, %s4642_s20  }
  0x12   :  { %s4643_s23 = smov [#allocation4]   ;;  %s4614_s27 = scalar_lea.hbm %s5149_s1, 9216 }
  0x13   :  { %s26_s24 = sshll.u32 %s4643_s23, 4  ;;  %p4615_p8 = scmp.ne.s32.totalorder %s5149_s1, %s4614_s27  ;;  %s27_s24 = int_to_ptr.vmem [resolvable:$true] %s26_s24 }
  0x14   :  { %p4618_p9 = scmp.lt.u32.totalorder %s4614_s27, %s5149_s1 }
  0x16   :  { %p4620_p10 = pnand %p4618_p9, %p4615_p8 }
  0x18   :  { %4623 = shalt.err (!%p4620_p10)
}
  0x19   :  { %s4624_s4 = scalar_lea.vmem %s27_s24, 9216  ;;  %p4629_p12 = scmp.lt.s32.totalorder %s27_s24, %s27_s24 }
  0x1a   :  { %p4625_p11 = scmp.ne.s32.totalorder %s27_s24, %s4624_s4  ;;  %p4630_p13 = scmp.lt.s32.totalorder %s4624_s4, %s4624_s4 }
  0x1c   :  { %p4631_p0 = por %p4630_p13, %p4629_p12 }
  0x1e   :  { %p4632_p1 = pnand %p4631_p0, %p4625_p11 }
  0x20   :  { %4635 = shalt.err (!%p4632_p1)
}
  0x21   :  { %s4644_s0 = smov 128   ;;  %s4645_s5 = smov 8  }
  0x22   :  { %32 = dma.hbm_to_vmem [thread:$0]  %s5149_s1, 9216, %s27_s24, [#allocation5], %s4644_s0, %s4644_s0, %s4645_s5  }
  0x23   :  { %4636 = dma.done.wait [#allocation3], 128  }
  0x24   :  { %4637 = vsyncadd [#allocation3], 4294967168 }
  0x25   :  { %4638 = dma.done.wait [#allocation5], 9216  }
  0x26   :  { %4639 = vsyncadd [#allocation5], 4294958080  ;;  %v41_v0 = vld [vmem:[#allocation2 + $0x4] sm:$0xf]  ;;  %v4646_v1 = vmov 0.0|0.0   ;;  %vm46_vm0 = vcmask 523264  }
  0x27   :  { %43 = vrot.lane.b32.xlu0 %v41_v0, %s4641_s19  ;;  %3943 = vmatprep.subr.bf16.mxu0 %v4646_v1  ;;  %v39_v2 = vld [vmem:[#allocation2] sm:$0xf]  ;;  %vm4647_vm1 = vmmov 0   ;;  %v4648_v3 = vmov 0.0   ;;  %vm48_vm2 = vcmask 1043456   ;;  %v4649_v5 = vmov 24  }
  0x28   :  { %3947 = vmatprep.subr.bf16.mxu1 %v4646_v1  ;;  %3567 = vmatprep.mubr.msk.f32.mxu0 %vm4647_vm1, %v4648_v3  ;;  %s4650_s1 = smov 127   ;;  %s4651_s8 = smov 1   ;;  %v50_v8 = vld [vmem:[#allocation4] sm:$0xff]  ;;  %v3281_v9 = vld [vmem:[#allocation4 + $0x208] ss:$0 sm:$0xff]  ;;  %vm4652_vm3 = vmmov 1  }
  0x29   :  { %3576 = vmatprep.mubr.msk.f32.mxu1 %vm4647_vm1, %v4648_v3  ;;  %4254 = vset.pattern.permute.xlu1 %v4649_v5  ;;  %vm3945_vm4 = vmpackc.low %vm48_vm2, %vm4652_vm3  ;;  %v3282_v13 = vld [vmem:[#allocation4 + $0x209] ss:$0 sm:$0xff]  ;;  %vm72_vm5 = vcmask 195584   ;;  %v4653_v22 = vmov 8   ;;  %v232_v24 = vld [vmem:[#allocation4 + $0x10] sm:$0xff]  ;;  %vm233_vm7 = vcmask 64512  }
  0x2a   :  { %4255 = vset.pattern.permute.xlu0 %v4649_v5  ;;  %v148_v23 = vld [vmem:[#allocation4 + $0x8] sm:$0xff]  ;;  %v314_v31 = vld [vmem:[#allocation4 + $0x190] sm:$0xff]  ;;  %v315_v33 = vld [vmem:[#allocation4 + $0x198] sm:$0xff]  ;;  %s4654_s9 = smov 63   ;;  %vm405_vm9 = vcmask 1048064   ;;  %s4655_s10 = smov 62  }
  0x2b   :  { %v313_v30 = vld [vmem:[#allocation4 + $0x188] sm:$0xff]  ;;  %v316_v34 = vld [vmem:[#allocation4 + $0x1a0] sm:$0xff]  ;;  %v318_v37 = vld [vmem:[#allocation4 + $0x1b0] sm:$0xff]  ;;  %s4656_s11 = smov 65   ;;  %s4657_s12 = smov 32   ;;  %vm835_vm13 = vcmask 1047808  }
  0x2c   :  { %v4741_v32 = vpack.c.bf16 %v314_v31, %v313_v30  ;;  %v4746_v35 = vpack.c.bf16 %v316_v34, %v315_v33  ;;  %v317_v36 = vld [vmem:[#allocation4 + $0x1a8] sm:$0xff]  ;;  %v319_v39 = vld [vmem:[#allocation4 + $0x1b8] sm:$0xff]  ;;  %v320_v40 = vld [vmem:[#allocation4 + $0x1c0] sm:$0xff]  ;;  %s4658_s13 = smov 31   ;;  %s4659_s14 = smov 97   ;;  %vm910_vm14 = vcmask 392192  }
  0x2d   :  { %v4752_v38 = vpack.c.bf16 %v318_v37, %v317_v36  ;;  %v4756_v41 = vpack.c.bf16 %v320_v40, %v319_v39  ;;  %v321_v42 = vld [vmem:[#allocation4 + $0x1c8] sm:$0xff]  ;;  %v322_v43 = vld [vmem:[#allocation4 + $0x1d0] sm:$0xff]  ;;  %v323_v45 = vld [vmem:[#allocation4 + $0x1d8] sm:$0xff]  ;;  %s4660_s15 = smov 30   ;;  %vm1291_vm3 = vcmask 261120   ;;  %s4664_s17 = smov 16  }
  0x2e   :  { %v3963_v44 = vpack.c.bf16 %v322_v43, %v321_v42  ;;  %v324_v46 = vld [vmem:[#allocation4 + $0x1e0] sm:$0xff]  ;;  %v325_v48 = vld [vmem:[#allocation4 + $0x1e8] sm:$0xff]  ;;  %v326_v49 = vld [vmem:[#allocation4 + $0x1f0] sm:$0xff]  ;;  %s4665_s18 = smov 15   ;;  %s4667_s20 = smov 113  }
  0x2f   :  { %v3966_v47 = vpack.c.bf16 %v324_v46, %v323_v45  ;;  %v3969_v50 = vpack.c.bf16 %v326_v49, %v325_v48  ;;  %v327_v51 = vld [vmem:[#allocation4 + $0x1f8] sm:$0xff]  ;;  %v328_v52 = vld [vmem:[#allocation4 + $0x200] sm:$0xff]  ;;  %s4669_s21 = smov 7   ;;  %s4670_s22 = smov 6  }
  0x30   :  { %v3972_v53 = vpack.c.bf16 %v328_v52, %v327_v51  ;;  %v526_v31 = vld [vmem:[#allocation4 + $0x20] sm:$0xff]  ;;  %v642_v51 = vld [vmem:[#allocation4 + $0x38] sm:$0xff]  ;;  %s4671_s23 = smov 121   ;;  %s4672_s24 = smov 126  }
  0x99   :  { %v44_v4 = vpop.permute.xlu0 %43 }
  0x9a   :  { %v47_v6 = vsel %vm46_vm0, %v39_v2, %v44_v4 }
  0x9b   :  { %v49_v7 = vsel %vm48_vm2, %v47_v6, 0.0 }
  0x9c   :  { %60 = vrot.lane.b32.xlu1 %v49_v7, %s4650_s1  ;;  %53 = vrot.lane.b32.xlu0 %v49_v7, %s4651_s8 }
  0xa0   :  { %69 = vperm.xlu1 %4254, %v50_v8  }
  0xa4   :  { %4256 = vset.pattern.permute.xlu1 %v4653_v22 }
 0x10e   :  { %v54_v10 = vpop.permute.xlu0 %53  ;;  %v61_v14 = vpop.permute.xlu1 %60 }
 0x10f   :  { %v59_v11 = vmul.f32 %v3281_v9, %v54_v10  ;;  %v66_v15 = vmul.f32 %v3282_v13, %v61_v14 }
 0x111   :  { %v3944_v12 = vpack.c.bf16 %v47_v6, %v59_v11 }
 0x113   :  { %3946 = vmatpush3.bf16.msk.msra.mxu0 %vm3945_vm4, %v3944_v12 }
 0x114   :  { %3565 = vmatprep.subr.mxu0 %v4648_v3 }
 0x117   :  { %3566 = vmatpush3.msra.mxu0 %v66_v15 }
 0x118   :  { %3568 = vmatmul.mubr.msk.f32.vlgmr.msra.gmra.mrb[0].mxu0 %vm72_vm5, %v50_v8  ;;  %3974 = vmatprep.subr.bf16.mxu0 %v4646_v1  ;;  %v3288_v8 = vld [vmem:[#allocation4 + $0x210] ss:$0 sm:$0xff] }
 0x119   :  { %3625 = vmatprep.mubr.msk.f32.mxu0 %vm4647_vm1, %v4648_v3 }
 0x11f   :  { %v70_v16 = vpop.permute.xlu1 %69 }
 0x1eb   :  { %v141_v17 = vpop.f32.mrb[0].mxu0 }
 0x1ec   :  { %v142_v18 = vadd.f32 %v141_v17, %v70_v16  ;;  %v3569_v19 = vpop.f32.mrb[1].mxu0  ;;  %v402_v17 = vld [vmem:[#allocation4 + $0x18] sm:$0xff] }
 0x1ee   :  { %v146_v20 = vmul.f32 0.1, %v142_v18  ;;  %vm145_vm6 = vcmp.ge.f32.partialorder %v142_v18, 0.0 }
 0x1f0   :  { %v147_v21 = vsel %vm145_vm6, %v142_v18, %v146_v20 }
 0x1f1   :  { %152 = vrot.lane.b32.xlu1 %v147_v21, %s4650_s1  ;;  %149 = vrot.lane.b32.xlu0 %v147_v21, %s4651_s8 }
 0x1f5   :  { %157 = vperm.xlu0 %4255, %v148_v23   ;;  %309 = vperm.xlu1 %4256, %v232_v24  }
 0x1f9   :  { %4262 = vset.pattern.permute.xlu1 %v4649_v5  ;;  %v3289_v5 = vld [vmem:[#allocation4 + $0x211] ss:$0 sm:$0xff] }
 0x263   :  { %v150_v25 = vpop.permute.xlu0 %149  ;;  %v153_v28 = vpop.permute.xlu1 %152 }
 0x264   :  { %v151_v26 = vmul.f32 %v3281_v9, %v150_v25  ;;  %v154_v29 = vmul.f32 %v3282_v13, %v153_v28 }
 0x266   :  { %v3948_v27 = vpack.c.bf16 %v147_v21, %v151_v26 }
 0x268   :  { %3949 = vmatpush3.bf16.msra.mxu1 %v3948_v27 }
 0x269   :  { %3574 = vmatprep.subr.mxu1 %v4648_v3 }
 0x26c   :  { %3575 = vmatpush3.msra.mxu1 %v154_v29 }
 0x26d   :  { %3577 = vmatmul.mubr.msk.f32.vlgmr.msra.gmra.mrb[0].mxu1 %vm72_vm5, %v148_v23  ;;  %3579 = vmatprep.subr.mxu1 %v4648_v3 }
 0x26e   :  { %3580 = vmatpush3.msk.msra.mxu1 %vm48_vm2, %v47_v6  ;;  %3581 = vmatprep.mubr.msk.f32.mxu1 %vm4647_vm1, %v4648_v3  ;;  %vm1165_vm2 = vcmask 130048  }
 0x26f   :  { %3950 = vmatprep.subr.bf16.mxu1 %v4646_v1  ;;  %vm4040_vm4 = vmpackc.low %vm1165_vm2, %vm1165_vm2 }
 0x271   :  { %3582 = vmatmul.mubr.msk.f32.vlgmr.msra.gmra.mrb[2].mxu1 %vm233_vm7, %v232_v24 }
 0x272   :  { %3952 = vmatpush3.bf16.msra.mxu1 %v4741_v32  ;;  %3616 = vmatprep.mubr.msk.f32.mxu1 %vm4647_vm1, %v4648_v3 }
 0x273   :  { %3953 = vmatprep.subr.bf16.mxu1 %v4646_v1 }
 0x274   :  { %v158_v55 = vpop.permute.xlu0 %157  ;;  %v310_v59 = vpop.permute.xlu1 %309 }
 0x276   :  { %3955 = vmatpush3.bf16.msra.mxu1 %v4746_v35 }
 0x277   :  { %3956 = vmatprep.subr.bf16.mxu1 %v4646_v1 }
 0x27a   :  { %3958 = vmatpush3.bf16.msra.mxu1 %v4752_v38 }
 0x27b   :  { %3959 = vmatprep.subr.bf16.mxu1 %v4646_v1 }
 0x27e   :  { %3961 = vmatpush3.bf16.msra.mxu1 %v4756_v41 }
 0x27f   :  { %3962 = vmatprep.subr.bf16.mxu1 %v4646_v1 }
 0x282   :  { %3964 = vmatpush3.bf16.msra.mxu1 %v3963_v44  ;;  %v641_v44 = vld [vmem:[#allocation4 + $0x30] sm:$0xff] }
 0x283   :  { %3965 = vmatprep.subr.bf16.mxu1 %v4646_v1 }
 0x286   :  { %3967 = vmatpush3.bf16.msra.mxu1 %v3966_v47  ;;  %v527_v47 = vld [vmem:[#allocation4 + $0x28] sm:$0xff] }
 0x287   :  { %3968 = vmatprep.subr.bf16.mxu1 %v4646_v1 }
 0x28a   :  { %3970 = vmatpush3.bf16.msra.mxu1 %v3969_v50 }
 0x28b   :  { %3971 = vmatprep.subr.bf16.mxu1 %v4646_v1 }
 0x28e   :  { %3973 = vmatpush3.bf16.msra.mxu1 %v3972_v53 }
 0x340   :  { %v228_v54 = vpop.f32.mrb[0].mxu1 }
 0x341   :  { %v3578_v56 = vpop.f32.mrb[1].mxu1  ;;  %v229_v57 = vadd.f32 %v228_v54, %v158_v55 }
 0x344   :  { %v303_v58 = vpop.f32.mrb[2].mxu1 }
 0x345   :  { %v307_v60 = vadd.f32 %v303_v58, %v229_v57  ;;  %v3583_v61 = vpop.f32.mrb[3].mxu1 }
 0x347   :  { %v312_v62 = vadd.f32 %v310_v59, %v307_v60 }
 0x349   :  { %3617 = vmatmul.mubr.f32.vlgmr.msra.gmra.mrb[4].mxu1 %v312_v62 }
 0x41c   :  { %v4764_v63 = vpop.f32.mrb[4].mxu1 }
 0x41d   :  { %v3618_v0 = vpop.f32.mrb[5].mxu1  ;;  %vm399_vm8 = vcmp.ge.f32.partialorder %v4764_v63, 0.0  ;;  %v400_v2 = vmul.f32 0.1, %v4764_v63 }
 0x41f   :  { %v401_v4 = vsel %vm399_vm8, %v4764_v63, %v400_v2 }
 0x420   :  { %406 = vrot.lane.b32.xlu1 %v401_v4, %s4641_s19 }
 0x424   :  { %426 = vrot.lane.b32.xlu1 %v3289_v5, %s4651_s8 }
 0x428   :  { %431 = vrot.lane.b32.xlu1 %v401_v4, %s4654_s9 }
 0x492   :  { %v407_v6 = vpop.permute.xlu1 %406 }
 0x493   :  { %v408_v7 = vsel %vm405_vm9, %v407_v6, %v401_v4 }
 0x494   :  { %409 = vrot.lane.b32.xlu0 %v408_v7, %s4641_s19 }
 0x496   :  { %v427_v9 = vpop.permute.xlu1 %426 }
 0x498   :  { %417 = vrot.lane.b32.xlu0 %v3288_v8, %s4654_s9 }
 0x49a   :  { %v432_v15 = vpop.permute.xlu1 %431 }
 0x506   :  { %v410_v10 = vpop.permute.xlu0 %409 }
 0x507   :  { %v411_v11 = vsel %vm405_vm9, %v410_v10, %v401_v4  ;;  %v3298_v10 = vld [vmem:[#allocation4 + $0x219] ss:$0 sm:$0xff] }
 0x508   :  { %v429_v12 = vmul.f32 %v427_v9, %v411_v11 }
 0x50a   :  { %v418_v13 = vpop.permute.xlu0 %417  ;;  %434 = vrot.lane.b32.xlu0 %v429_v12, %s4655_s10 }
 0x50b   :  { %v420_v14 = vmul.f32 %v418_v13, %v411_v11 }
 0x50d   :  { %v4257_v16 = vpack.i.bf16 %v432_v15, %v420_v14 }
 0x50f   :  { %4258 = vrot.lane.b32.xlu1 %v4257_v16, %s4656_s11 }
 0x513   :  { %438 = vperm.xlu1 %4262, %v402_v17  }
 0x57c   :  { %v435_v18 = vpop.permute.xlu0 %434 }
 0x57d   :  { %446 = vrot.lane.b32.xlu0 %v435_v18, %s4656_s11 }
 0x581   :  { %v4259_v19 = vpop.permute.xlu1 %4258 }
 0x582   :  { %v4261_v20 = vunpack.i.h.bf16 %v4259_v19  ;;  %v4260_v21 = vunpack.i.l.bf16 %v4259_v19 }
 0x584   :  { %v3975_v23 = vpack.c.bf16 %v4261_v20, %v4260_v21 }
 0x586   :  { %3976 = vmatpush3.bf16.msra.mxu0 %v3975_v23 }
 0x587   :  { %3623 = vmatprep.subr.mxu0 %v4648_v3 }
 0x592   :  { %v439_v25 = vpop.permute.xlu1 %438 }
 0x5ef   :  { %v447_v24 = vpop.permute.xlu0 %446 }
 0x5f0   :  { %3624 = vmatpush3.msra.mxu0 %v447_v24 }
 0x5f1   :  { %3626 = vmatmul.mubr.msk.f32.vlgmr.msra.gmra.mrb[2].mxu0 %vm72_vm5, %v402_v17 }
 0x5f2   :  { %3634 = vmatprep.mubr.msk.f32.mxu0 %vm72_vm5, %v526_v31 }
 0x6c4   :  { %v519_v26 = vpop.f32.mrb[2].mxu0 }
 0x6c5   :  { %v520_v27 = vadd.f32 %v519_v26, %v439_v25  ;;  %v3627_v28 = vpop.f32.mrb[3].mxu0  ;;  %v831_v26 = vld [vmem:[#allocation4 + $0x40] sm:$0xff] }
 0x6c6   :  { %3673 = vmatprep.mubr.msk.f32.mxu1 %vm910_vm14, %v831_v26 }
 0x6c7   :  { %vm523_vm10 = vcmp.ge.f32.partialorder %v520_v27, 0.0  ;;  %v524_v29 = vmul.f32 0.1, %v520_v27 }
 0x6c9   :  { %v525_v30 = vsel %vm523_vm10, %v520_v27, %v524_v29  ;;  %vm1871_vm10 = vcmask 785408  }
 0x6ca   :  { %528 = vrot.lane.b32.xlu0 %v525_v30, %s4641_s19 }
 0x6ce   :  { %537 = vrot.lane.b32.xlu0 %v525_v30, %s4654_s9 }
 0x73c   :  { %v529_v33 = vpop.permute.xlu0 %528 }
 0x73d   :  { %v530_v34 = vsel %vm405_vm9, %v529_v33, %v525_v30 }
 0x73e   :  { %531 = vrot.lane.b32.xlu1 %v530_v34, %s4641_s19  ;;  %s4666_s19 = smov 14  }
 0x740   :  { %v538_v42 = vpop.permute.xlu0 %537 }
 0x7b0   :  { %v532_v36 = vpop.permute.xlu1 %531 }
 0x7b1   :  { %v533_v37 = vsel %vm405_vm9, %v532_v36, %v525_v30  ;;  %vm1738_vm9 = vcmask 1047680  }
 0x7b2   :  { %v534_v39 = vmul.f32 %v533_v37, %v418_v13  ;;  %v535_v40 = vmul.f32 %v533_v37, %v427_v9  ;;  %v3297_v9 = vld [vmem:[#allocation4 + $0x218] ss:$0 sm:$0xff] }
 0x7b4   :  { %540 = vrot.lane.b32.xlu1 %v535_v40, %s4655_s10  ;;  %v4263_v43 = vpack.i.bf16 %v538_v42, %v534_v39  ;;  %v832_v40 = vld [vmem:[#allocation4 + $0x48] sm:$0xff] }
 0x7b6   :  { %4264 = vrot.lane.b32.xlu0 %v4263_v43, %s4656_s11 }
 0x7ba   :  { %544 = vperm.xlu0 %4255, %v526_v31   ;;  %v4661_v31 = vmov 48  }
 0x7be   :  { %4268 = vset.pattern.permute.xlu0 %v4653_v22 }
 0x7bf   :  { %727 = vperm.xlu0 %4268, %v641_v44  }
 0x7c3   :  { %4295 = vset.pattern.permute.xlu0 %v4661_v31 }
 0x826   :  { %v541_v45 = vpop.permute.xlu1 %540 }
 0x827   :  { %557 = vrot.lane.b32.xlu1 %v541_v45, %s4656_s11 }
 0x828   :  { %v4265_v46 = vpop.permute.xlu0 %4264 }
 0x829   :  { %v4267_v48 = vunpack.i.h.bf16 %v4265_v46  ;;  %v4266_v49 = vunpack.i.l.bf16 %v4265_v46 }
 0x82b   :  { %549 = vperm.xlu1 %4262, %v527_v47   ;;  %v3977_v50 = vpack.c.bf16 %v4267_v48, %v4266_v49 }
 0x82d   :  { %3978 = vmatprep.subr.bf16.mxu0 %v3977_v50 }
 0x82e   :  { %3980 = vmatpush3.bf16.msra.mxu0 %v3977_v50 }
 0x82f   :  { %4269 = vset.pattern.permute.xlu1 %v4653_v22 }
 0x830   :  { %731 = vperm.xlu1 %4269, %v642_v51  }
 0x834   :  { %4296 = vset.pattern.permute.xlu1 %v4661_v31 }
 0x839   :  { %v545_v22 = vpop.permute.xlu0 %544 }
 0x83e   :  { %v728_v57 = vpop.permute.xlu0 %727 }
 0x899   :  { %v558_v52 = vpop.permute.xlu1 %557 }
 0x89a   :  { %3632 = vmatprep.subr.mxu0 %v558_v52 }
 0x89b   :  { %3633 = vmatpush3.msra.mxu0 %v558_v52 }
 0x89c   :  { %3635 = vmatmul.mubr.msk.f32.vlgmr.msra.gmra.mrb[4].mxu0 %vm72_vm5, %v527_v47  ;;  %3637 = vmatprep.subr.mxu0 %v4764_v63 }
 0x89d   :  { %3638 = vmatpush3.msra.mxu0 %v4764_v63  ;;  %3639 = vmatprep.mubr.msk.f32.mxu0 %vm233_vm7, %v641_v44 }
 0x89e   :  { %3982 = vmatprep.subr.bf16.mxu0 %v4741_v32 }
 0x8a4   :  { %3640 = vmatmul.mubr.msk.f32.vlgmr.msra.gmra.mrb[4].mxu0 %vm233_vm7, %v642_v51 }
 0x8a5   :  { %3984 = vmatpush3.bf16.msra.mxu0 %v4741_v32 }
 0x8a6   :  { %3986 = vmatprep.subr.bf16.mxu0 %v4746_v35 }
 0x8a9   :  { %3988 = vmatpush3.bf16.msra.mxu0 %v4746_v35 }
 0x8aa   :  { %3990 = vmatprep.subr.bf16.mxu0 %v4752_v38  ;;  %v550_v53 = vpop.permute.xlu1 %549 }
 0x8ad   :  { %3992 = vmatpush3.bf16.msra.mxu0 %v4752_v38 }
 0x8ae   :  { %3994 = vmatprep.subr.bf16.mxu0 %v4756_v41 }
 0x8af   :  { %v732_v59 = vpop.permute.xlu1 %731 }
 0x8b1   :  { %3996 = vmatpush3.bf16.msra.mxu0 %v4756_v41 }
 0x977   :  { %v3641_v54 = vpop.f32.mrb[4].mxu0 }
 0x978   :  { %v4191_v55 = vadd.f32 %v3641_v54, %v550_v53  ;;  %v715_v56 = vpop.f32.mrb[5].mxu0  ;;  %v996_v54 = vld [vmem:[#allocation4 + $0x50] sm:$0xff] }
 0x979   :  { %v4192_v58 = vadd.f32 %v715_v56, %v545_v22 }
 0x97a   :  { %v735_v61 = vadd.f32 %v4191_v55, %v732_v59 }
 0x97b   :  { %v734_v60 = vadd.f32 %v4192_v58, %v728_v57 }
 0x97d   :  { %3658 = vmatprep.mubr.msk.f32.mxu0 %vm46_vm0, %v734_v60 }
 0x97e   :  { %3659 = vmatmul.mubr.msk.f32.vlgmr.msra.gmra.mrb[6].mxu0 %vm46_vm0, %v735_v61 }
 0x97f   :  { %3688 = vmatprep.mubr.msk.f32.mxu0 %vm910_vm14, %v996_v54 }
 0xa51   :  { %v3660_v62 = vpop.f32.mrb[6].mxu0 }
 0xa52   :  { %v828_v38 = vmul.f32 0.1, %v3660_v62  ;;  %v816_v63 = vpop.f32.mrb[7].mxu0  ;;  %vm826_vm11 = vcmp.ge.f32.partialorder %v3660_v62, 0.0 }
 0xa53   :  { %v827_v0 = vmul.f32 0.1, %v816_v63  ;;  %vm825_vm12 = vcmp.ge.f32.partialorder %v816_v63, 0.0  ;;  %v4807_v41 = vpack.c.bf16 %v3660_v62, %v816_v63 }
 0xa54   :  { %v830_v2 = vsel %vm826_vm11, %v3660_v62, %v828_v38 }
 0xa55   :  { %839 = vrot.lane.b32.xlu0 %v830_v2, %s4657_s12  ;;  %v829_v4 = vsel %vm825_vm12, %v816_v63, %v827_v0 }
 0xa56   :  { %836 = vrot.lane.b32.xlu1 %v829_v4, %s4657_s12  ;;  %v4270_v11 = vpack.i.bf16 %v830_v2, %v829_v4 }
 0xac7   :  { %v840_v5 = vpop.permute.xlu0 %839 }
 0xac8   :  { %v837_v6 = vpop.permute.xlu1 %836  ;;  %v841_v7 = vsel %vm835_vm13, %v840_v5, %v830_v2 }
 0xac9   :  { %844 = vrot.lane.b32.xlu0 %v841_v7, %s4657_s12  ;;  %v838_v8 = vsel %vm835_vm13, %v837_v6, %v829_v4 }
 0xaca   :  { %842 = vrot.lane.b32.xlu1 %v838_v8, %s4657_s12 }
 0xacd   :  { %853 = vrot.lane.b32.xlu0 %v3297_v9, %s4658_s13 }
 0xace   :  { %863 = vrot.lane.b32.xlu1 %v3298_v10, %s4651_s8 }
 0xad2   :  { %4271 = vrot.lane.b32.xlu1 %v4270_v11, %s4658_s13 }
 0xb3b   :  { %v845_v12 = vpop.permute.xlu0 %844 }
 0xb3c   :  { %v843_v13 = vpop.permute.xlu1 %842  ;;  %v847_v14 = vsel %vm835_vm13, %v845_v12, %v830_v2 }
 0xb3d   :  { %v846_v15 = vsel %vm835_vm13, %v843_v13, %v829_v4 }
 0xb3f   :  { %v4820_v16 = vpop.permute.xlu0 %853 }
 0xb40   :  { %v4822_v17 = vpop.permute.xlu1 %863  ;;  %v856_v18 = vmul.f32 %v4820_v16, %v846_v15  ;;  %v857_v19 = vmul.f32 %v4820_v16, %v847_v14 }
 0xb41   :  { %v866_v20 = vmul.f32 %v4822_v17, %v846_v15  ;;  %v867_v21 = vmul.f32 %v4822_v17, %v847_v14  ;;  %v997_v15 = vld [vmem:[#allocation4 + $0x58] sm:$0xff] }
 0xb42   :  { %v4280_v23 = vpack.i.bf16 %v857_v19, %v856_v18  ;;  %v1162_v18 = vld [vmem:[#allocation4 + $0x78] sm:$0xff]  ;;  %v4662_v19 = vmov 16  }
 0xb43   :  { %v4275_v24 = vpack.i.bf16 %v867_v21, %v866_v20  ;;  %v998_v20 = vld [vmem:[#allocation4 + $0x60] sm:$0xff]  ;;  %v999_v21 = vld [vmem:[#allocation4 + $0x68] sm:$0xff] }
 0xb44   :  { %4281 = vrot.lane.b32.xlu1 %v4280_v23, %s4659_s14  ;;  %v4272_v25 = vpop.permute.xlu1 %4271  ;;  %v1163_v23 = vld [vmem:[#allocation4 + $0x80] sm:$0xff] }
 0xb45   :  { %4276 = vrot.lane.b32.xlu0 %v4275_v24, %s4660_s15  ;;  %v1164_v24 = vld [vmem:[#allocation4 + $0x88] sm:$0xff] }
 0xb49   :  { %4286 = vrot.lane.b32.xlu0 %v4272_v25, %s4659_s14 }
 0xb4d   :  { %882 = vperm.xlu0 %4295, %v831_v26  }
 0xbb6   :  { %v4282_v27 = vpop.permute.xlu1 %4281 }
 0xbb7   :  { %v4284_v28 = vunpack.i.h.bf16 %v4282_v27  ;;  %v4283_v29 = vunpack.i.l.bf16 %v4282_v27  ;;  %v4277_v30 = vpop.permute.xlu0 %4276 }
 0xbb8   :  { %4291 = vrot.lane.b32.xlu1 %v4277_v30, %s4659_s14 }
 0xbb9   :  { %v3997_v33 = vpack.c.bf16 %v4284_v28, %v4283_v29 }
 0xbbb   :  { %3998 = vmatprep.subr.bf16.mxu1 %v3997_v33  ;;  %v4287_v34 = vpop.permute.xlu0 %4286 }
 0xbbc   :  { %v4289_v36 = vunpack.i.h.bf16 %v4287_v34  ;;  %v4288_v37 = vunpack.i.l.bf16 %v4287_v34  ;;  %4000 = vmatpush3.bf16.msra.mxu1 %v3997_v33  ;;  %887 = vperm.xlu1 %4296, %v832_v40  }
 0xbbe   :  { %v4001_v39 = vpack.c.bf16 %v4289_v36, %v4288_v37 }
 0xbc0   :  { %4002 = vmatprep.subr.bf16.mxu1 %v4001_v39 }
 0xbc1   :  { %4004 = vmatpush3.bf16.msra.mxu1 %v4001_v39 }
 0xbcc   :  { %v883_v47 = vpop.permute.xlu0 %882 }
 0xc2a   :  { %v4292_v42 = vpop.permute.xlu1 %4291 }
 0xc2b   :  { %v4294_v43 = vunpack.i.h.bf16 %v4292_v42  ;;  %v4293_v44 = vunpack.i.l.bf16 %v4292_v42 }
 0xc2d   :  { %v4005_v45 = vpack.c.bf16 %v4294_v43, %v4293_v44 }
 0xc2f   :  { %4006 = vmatprep.subr.bf16.mxu1 %v4005_v45 }
 0xc30   :  { %4008 = vmatpush3.bf16.msra.mxu1 %v4005_v45 }
 0xc31   :  { %4026 = vmatprep.subr.bf16.mxu1 %v4741_v32 }
 0xc33   :  { %3674 = vmatmul.mubr.msk.f32.vlgmr.msra.gmra.mrb[6].mxu1 %vm910_vm14, %v832_v40 }
 0xc34   :  { %4028 = vmatpush3.bf16.msra.mxu1 %v4741_v32 }
 0xc35   :  { %4030 = vmatprep.subr.bf16.mxu1 %v4746_v35 }
 0xc38   :  { %4032 = vmatpush3.bf16.msra.mxu1 %v4746_v35 }
 0xc39   :  { %4033 = vmatprep.subr.bf16.mxu1 %v4646_v1 }
 0xc3b   :  { %v888_v46 = vpop.permute.xlu1 %887 }
 0xd06   :  { %v3675_v48 = vpop.f32.mrb[6].mxu1 }
 0xd07   :  { %v987_v49 = vadd.f32 %v3675_v48, %v888_v46  ;;  %v981_v50 = vpop.f32.mrb[7].mxu1 }
 0xd08   :  { %v982_v51 = vadd.f32 %v981_v50, %v883_v47 }
 0xd09   :  { %vm991_vm15 = vcmp.ge.f32.partialorder %v987_v49, 0.0  ;;  %v993_v52 = vmul.f32 0.1, %v987_v49 }
 0xd0a   :  { %vm990_vm0 = vcmp.ge.f32.partialorder %v982_v51, 0.0  ;;  %v992_v22 = vmul.f32 0.1, %v982_v51 }
 0xd0b   :  { %v995_v53 = vsel %vm991_vm15, %v987_v49, %v993_v52  ;;  %v1389_v52 = vld [vmem:[#allocation4 + $0x90] sm:$0xff] }
 0xd0c   :  { %1003 = vrot.lane.b32.xlu0 %v995_v53, %s4657_s12  ;;  %v994_v32 = vsel %vm990_vm0, %v982_v51, %v992_v22  ;;  %v4663_v22 = vmov 32  }
 0xd0d   :  { %1000 = vrot.lane.b32.xlu1 %v994_v32, %s4657_s12  ;;  %v4297_v58 = vpack.i.bf16 %v995_v53, %v994_v32 }
 0xd7e   :  { %v1004_v35 = vpop.permute.xlu0 %1003 }
 0xd7f   :  { %v1001_v55 = vpop.permute.xlu1 %1000  ;;  %v1005_v56 = vsel %vm835_vm13, %v1004_v35, %v995_v53 }
 0xd80   :  { %1008 = vrot.lane.b32.xlu0 %v1005_v56, %s4657_s12  ;;  %v1002_v57 = vsel %vm835_vm13, %v1001_v55, %v994_v32 }
 0xd81   :  { %1006 = vrot.lane.b32.xlu1 %v1002_v57, %s4657_s12 }
 0xd85   :  { %4298 = vrot.lane.b32.xlu1 %v4297_v58, %s4658_s13 }
 0xdf2   :  { %v1009_v59 = vpop.permute.xlu0 %1008 }
 0xdf3   :  { %v1011_v60 = vsel %vm835_vm13, %v1009_v59, %v995_v53  ;;  %v1007_v61 = vpop.permute.xlu1 %1006 }
 0xdf4   :  { %v1013_v62 = vmul.f32 %v1011_v60, %v4820_v16  ;;  %v1015_v38 = vmul.f32 %v1011_v60, %v4822_v17  ;;  %v1010_v63 = vsel %vm835_vm13, %v1007_v61, %v994_v32 }
 0xdf5   :  { %v1012_v0 = vmul.f32 %v1010_v63, %v4820_v16  ;;  %v1014_v2 = vmul.f32 %v1010_v63, %v4822_v17  ;;  %v1161_v17 = vld [vmem:[#allocation4 + $0x70] sm:$0xff] }
 0xdf7   :  { %v4299_v4 = vpop.permute.xlu1 %4298  ;;  %v4302_v5 = vpack.i.bf16 %v1015_v38, %v1014_v2  ;;  %v4307_v6 = vpack.i.bf16 %v1013_v62, %v1012_v0  ;;  %v1391_v38 = vld [vmem:[#allocation4 + $0x230] sm:$0xff]  ;;  %v1392_v0 = vld [vmem:[#allocation4 + $0x238] sm:$0xff] }
 0xdf9   :  { %4303 = vrot.lane.b32.xlu0 %v4302_v5, %s4660_s15  ;;  %4308 = vrot.lane.b32.xlu1 %v4307_v6, %s4659_s14 }
 0xdfd   :  { %4313 = vrot.lane.b32.xlu0 %v4299_v4, %s4659_s14 }
 0xe01   :  { %1030 = vperm.xlu0 %4295, %v996_v54  }
 0xe05   :  { %4322 = vset.pattern.permute.xlu0 %v4662_v19 }
 0xe06   :  { %1268 = vperm.xlu0 %4322, %v1161_v17  }
 0xe0a   :  { %4325 = vset.pattern.permute.xlu0 %v4661_v31 }
 0xe0b   :  { %1045 = vperm.xlu0 %4325, %v999_v21  }
 0xe0f   :  { %4327 = vset.pattern.permute.xlu0 %v4663_v22 }
 0xe10   :  { %1395 = vperm.xlu0 %4327, %v1389_v52  }
 0xe6b   :  { %v4304_v7 = vpop.permute.xlu0 %4303  ;;  %v4309_v8 = vpop.permute.xlu1 %4308 }
 0xe6c   :  { %v4311_v9 = vunpack.i.h.bf16 %v4309_v8  ;;  %v4310_v10 = vunpack.i.l.bf16 %v4309_v8  ;;  %4318 = vrot.lane.b32.xlu1 %v4304_v7, %s4659_s14 }
 0xe6e   :  { %v4009_v11 = vpack.c.bf16 %v4311_v9, %v4310_v10 }
 0xe6f   :  { %v4314_v12 = vpop.permute.xlu0 %4313 }
 0xe70   :  { %v4316_v13 = vunpack.i.h.bf16 %v4314_v12  ;;  %v4315_v14 = vunpack.i.l.bf16 %v4314_v12  ;;  %4010 = vmatprep.subr.bf16.mxu0 %v4009_v11  ;;  %1035 = vperm.xlu1 %4296, %v997_v15  }
 0xe71   :  { %4012 = vmatpush3.bf16.msra.mxu0 %v4009_v11 }
 0xe72   :  { %v4013_v16 = vpack.c.bf16 %v4316_v13, %v4315_v14 }
 0xe74   :  { %4014 = vmatprep.subr.bf16.mxu0 %v4013_v16  ;;  %4323 = vset.pattern.permute.xlu1 %v4662_v19 }
 0xe75   :  { %4016 = vmatpush3.bf16.msra.mxu0 %v4013_v16  ;;  %1272 = vperm.xlu1 %4323, %v1162_v18  }
 0xe79   :  { %4324 = vset.pattern.permute.xlu1 %v4661_v31 }
 0xe7a   :  { %1040 = vperm.xlu1 %4324, %v998_v20  }
 0xe7e   :  { %4326 = vset.pattern.permute.xlu1 %v4662_v19 }
 0xe7f   :  { %1276 = vperm.xlu1 %4326, %v1163_v23  }
 0xe80   :  { %v1031_v31 = vpop.permute.xlu0 %1030 }
 0xe83   :  { %1280 = vperm.xlu1 %4326, %v1164_v24  }
 0xe85   :  { %v1269_v34 = vpop.permute.xlu0 %1268 }
 0xe8a   :  { %v1046_v42 = vpop.permute.xlu0 %1045 }
 0xe8f   :  { %v1396_v57 = vpop.permute.xlu0 %1395 }
 0xede   :  { %v4319_v25 = vpop.permute.xlu1 %4318 }
 0xedf   :  { %v4321_v26 = vunpack.i.h.bf16 %v4319_v25  ;;  %v4320_v27 = vunpack.i.l.bf16 %v4319_v25 }
 0xee1   :  { %v4017_v28 = vpack.c.bf16 %v4321_v26, %v4320_v27 }
 0xee3   :  { %4018 = vmatprep.subr.bf16.mxu0 %v4017_v28 }
 0xee4   :  { %4020 = vmatpush3.bf16.msra.mxu0 %v4017_v28 }
 0xee5   :  { %4022 = vmatprep.subr.bf16.mxu0 %v4807_v41 }
 0xee7   :  { %3689 = vmatmul.mubr.msk.f32.vlgmr.msra.gmra.mrb[8].mxu0 %vm910_vm14, %v997_v15 }
 0xee8   :  { %4024 = vmatpush3.bf16.msra.mxu0 %v4807_v41  ;;  %3691 = vmatprep.mubr.msk.f32.mxu0 %vm910_vm14, %v998_v20 }
 0xeeb   :  { %3692 = vmatmul.mubr.msk.f32.gmra.mrb[10].mxu0 %vm910_vm14, %v999_v21 }
 0xeec   :  { %3698 = vmatprep.mubr.msk.f32.mxu0 %vm1165_vm2, %v1161_v17 }
 0xeef   :  { %3699 = vmatmul.mubr.msk.f32.vlgmr.msra.gmra.mrb[8].mxu0 %vm1165_vm2, %v1162_v18  ;;  %v1036_v29 = vpop.permute.xlu1 %1035  ;;  %v1390_v18 = vld [vmem:[#allocation4 + $0x98] sm:$0x1] }
 0xef0   :  { %3701 = vmatprep.mubr.msk.f32.mxu0 %vm1165_vm2, %v1163_v23  ;;  %4219 = vpush %v1390_v18 }
 0xef3   :  { %3702 = vmatmul.mubr.msk.f32.gmra.mrb[10].mxu0 %vm1165_vm2, %v1164_v24 }
 0xef4   :  { %v1273_v30 = vpop.permute.xlu1 %1272 }
 0xef9   :  { %v1041_v33 = vpop.permute.xlu1 %1040 }
 0xefe   :  { %v1277_v39 = vpop.permute.xlu1 %1276 }
 0xf02   :  { %v1281_v49 = vpop.permute.xlu1 %1280 }
 0xf21   :  { %s4220_s16 = spop %4219 }
 0xf22   :  { %v1710_v27 = vstv %s4220_s16 }
 0xfc2   :  { %v3700_v36 = vpop.f32.mrb[8].mxu0 }
 0xfc3   :  { %v4193_v41 = vadd.f32 %v3700_v36, %v1036_v29  ;;  %v1244_v37 = vpop.f32.mrb[9].mxu0 }
 0xfc4   :  { %v4194_v40 = vadd.f32 %v1244_v37, %v1031_v31 }
 0xfc5   :  { %v1284_v45 = vadd.f32 %v4193_v41, %v1273_v30 }
 0xfc6   :  { %v1283_v43 = vadd.f32 %v4194_v40, %v1269_v34  ;;  %v3703_v44 = vpop.f32.mrb[10].mxu0 }
 0xfc7   :  { %v4195_v46 = vadd.f32 %v3703_v44, %v1046_v42  ;;  %v1254_v47 = vpop.f32.mrb[11].mxu0 }
 0xfc8   :  { %v4196_v48 = vadd.f32 %v1254_v47, %v1041_v33  ;;  %3712 = vmatprep.mubr.msk.f32.mxu1 %vm1291_vm3, %v1283_v43 }
 0xfc9   :  { %3713 = vmatmul.mubr.msk.f32.vlgmr.msra.gmra.mrb[8].mxu1 %vm1291_vm3, %v1284_v45  ;;  %v1286_v51 = vadd.f32 %v4195_v46, %v1281_v49 }
 0xfca   :  { %v1285_v50 = vadd.f32 %v4196_v48, %v1277_v39 }
 0xfcc   :  { %3715 = vmatprep.mubr.msk.f32.mxu1 %vm1291_vm3, %v1285_v50 }
 0xfcd   :  { %3716 = vmatmul.mubr.msk.f32.gmra.mrb[10].mxu1 %vm1291_vm3, %v1286_v51 }
 0xfce   :  { %3726 = vmatprep.mubr.msk.f32.mxu1 %vm4647_vm1, %v4648_v3 }
0x109c   :  { %v4877_v53 = vpop.f32.mrb[8].mxu1 }
0x109d   :  { %v4879_v32 = vpop.f32.mrb[9].mxu1 }
0x109e   :  { %v4034_v54 = vpack.c.bf16 %v4877_v53, %v4879_v32 }
0x10a0   :  { %v4883_v35 = vpop.f32.mrb[10].mxu1  ;;  %4035 = vmatpush3.bf16.msra.mxu1 %v4034_v54 }
0x10a1   :  { %v4885_v55 = vpop.f32.mrb[11].mxu1  ;;  %4036 = vmatprep.subr.bf16.mxu1 %v4646_v1 }
0x10a2   :  { %v4037_v56 = vpack.c.bf16 %v4883_v35, %v4885_v55 }
0x10a4   :  { %4038 = vmatpush3.bf16.msra.mxu1 %v4037_v56 }
0x10a7   :  { %3727 = vmatmul.mubr.msk.f32.vlgmr.msra.gmra.mrb[12].mxu1 %vm1291_vm3, %v1389_v52 }
0x10a8   :  { %3738 = vmatprep.mubr.msk.f32.mxu1 %vm1165_vm2, %v4879_v32 }
0x117a   :  { %v1466_v58 = vpop.f32.mrb[12].mxu1 }
0x117b   :  { %v1467_v59 = vadd.f32 %v1466_v58, %v1396_v57  ;;  %v3728_v60 = vpop.f32.mrb[13].mxu1 }
0x117d   :  { %1470 = vxpose.xlu1.b32.start.end [1/1] (short) (narrow) %v1467_v59, 16  ;;  %3729 = vmatprep.subr.mxu0 %v1467_v59 }
0x117e   :  { %3730 = vmatpush3.msra.mxu0 %v1467_v59 }
0x11fd   :  { %v1486_v61 = vpop.trf.xlu1 }
0x11fe   :  { %3731 = vmatprep.mubr.msk.f32.mxu0 %vm233_vm7, %v1486_v61  ;;  %v3322_v61 = vld [vmem:[#allocation4 + $0x220] ss:$0 sm:$0xff] }
0x1201   :  { %v1487_v62 = vpop.trf.xlu1 }
0x1202   :  { %3732 = vmatmul.mubr.msk.f32.vlgmr.msra.gmra.mrb[12].mxu0 %vm233_vm7, %v1487_v62 }
0x12d5   :  { %v3733_v63 = vpop.f32.mrb[12].mxu0 }
0x12d6   :  { %v1574_v2 = vpop.f32.mrb[13].mxu0  ;;  %v1580_v5 = vadd.f32 %v3733_v63, %v1392_v0 }
0x12d7   :  { %v1575_v4 = vadd.f32 %v1574_v2, %v1391_v38 }
0x12d8   :  { %v1586_v7 = vsel %vm1165_vm2, %v1580_v5, -inf }
0x12d9   :  { %v1583_v6 = vsel %vm1165_vm2, %v1575_v4, -inf }
0x12da   :  { %1584 = vmax.xlane.f32.xlu0 %v1583_v6 }
0x12de   :  { %1587 = vmax.xlane.f32.xlu0 %v1586_v7 }
0x1367   :  { %v1585_v8 = vpop.xlane.xlu0 %1584 }
0x1368   :  { %v1589_v9 = vsub.f32 %v1575_v4, %v1585_v8 }
0x136a   :  { %v1591_v10 = vmul.f32 1.442695, %v1589_v9 }
0x136b   :  { %v1588_v11 = vpop.xlane.xlu0 %1587 }
0x136c   :  { %4584 = vpow2.f32 %v1591_v10  ;;  %v1590_v12 = vsub.f32 %v1580_v5, %v1588_v11 }
0x136e   :  { %v1593_v13 = vmul.f32 1.442695, %v1590_v12 }
0x1370   :  { %4586 = vpow2.f32 %v1593_v13 }
0x1376   :  { %v4585_v14 = vpop.eup %4584 }
0x1377   :  { %v1595_v15 = vsel %vm1165_vm2, %v4585_v14, 0.0 }
0x1378   :  { %1596 = vadd.xlane.f32.xlu1 %v1595_v15 }
0x137a   :  { %v4587_v16 = vpop.eup %4586 }
0x137b   :  { %v1598_v17 = vsel %vm1165_vm2, %v4587_v16, 0.0 }
0x137c   :  { %1599 = vadd.xlane.f32.xlu0 %v1598_v17 }
0x1405   :  { %v1597_v19 = vpop.xlane.xlu1 %1596 }
0x1406   :  { %4588 = vrcp.f32 %v1597_v19 }
0x1409   :  { %v1600_v20 = vpop.xlane.xlu0 %1599 }
0x140a   :  { %4590 = vrcp.f32 %v1600_v20 }
0x1410   :  { %v4589_v21 = vpop.eup %4588 }
0x1411   :  { %v1603_v24 = vmul.f32 %v4589_v21, %v4585_v14 }
0x1414   :  { %v4591_v23 = vpop.eup %4590 }
0x1415   :  { %v1604_v25 = vmul.f32 %v4591_v23, %v4587_v16 }
0x1417   :  { %v4039_v26 = vpack.c.bf16 %v1604_v25, %v1603_v24 }
0x1419   :  { %4041 = vmatprep.subr.msk.bf16.mxu1 %vm4040_vm4, %v4039_v26 }
0x141a   :  { %4044 = vmatpush3.bf16.xpose.msk.msra.mxu1 %vm4040_vm4, %v4039_v26  ;;  %v1732_v26 = vld [vmem:[#allocation4 + $0xa0] sm:$0xff] }
0x141b   :  { %3768 = vmatprep.mubr.msk.f32.mxu0 %vm1871_vm10, %v1732_v26 }
0x1421   :  { %3739 = vmatmul.mubr.msk.f32.vlgmr.msra.gmra.mrb[14].mxu1 %vm1165_vm2, %v4877_v53 }
0x1422   :  { %3741 = vmatprep.mubr.msk.f32.mxu1 %vm1165_vm2, %v4885_v55 }
0x1425   :  { %3742 = vmatmul.mubr.msk.f32.gmra.mrb[16].mxu1 %vm1165_vm2, %v4883_v35 }
0x14f4   :  { %v3740_v28 = vpop.f32.mrb[14].mxu1 }
0x14f5   :  { %v1713_v29 = vmul.f32 %v3740_v28, %v1710_v27  ;;  %v1689_v30 = vpop.f32.mrb[15].mxu1 }
0x14f6   :  { %v1712_v31 = vmul.f32 %v1710_v27, %v1689_v30 }
0x14f7   :  { %v1717_v33 = vadd.f32 %v4877_v53, %v1713_v29  ;;  %v3323_v53 = vld [vmem:[#allocation4 + $0x221] ss:$0 sm:$0xff] }
0x14f8   :  { %v1716_v34 = vadd.f32 %v1712_v31, %v4879_v32  ;;  %v3743_v36 = vpop.f32.mrb[16].mxu1 }
0x14f9   :  { %v1715_v41 = vmul.f32 %v3743_v36, %v1710_v27  ;;  %v1699_v37 = vpop.f32.mrb[17].mxu1  ;;  %vm1721_vm5 = vcmp.ge.f32.partialorder %v1717_v33, 0.0  ;;  %v1725_v39 = vmul.f32 0.1, %v1717_v33  ;;  %v4668_v36 = vmov 96  }
0x14fa   :  { %v1714_v40 = vmul.f32 %v1710_v27, %v1699_v37  ;;  %v4909_v42 = vpack.c.bf16 %v1717_v33, %v1716_v34  ;;  %v1724_v45 = vmul.f32 0.1, %v1716_v34  ;;  %vm1720_vm6 = vcmp.ge.f32.partialorder %v1716_v34, 0.0  ;;  %4378 = vset.pattern.permute.xlu0 %v4668_v36  ;;  %4379 = vset.pattern.permute.xlu1 %v4668_v36 }
0x14fb   :  { %v1719_v43 = vadd.f32 %v4883_v35, %v1715_v41  ;;  %v1729_v44 = vsel %vm1721_vm5, %v1717_v33, %v1725_v39  ;;  %vm2432_vm5 = vcmask 1047616  }
0x14fc   :  { %v1718_v46 = vadd.f32 %v1714_v40, %v4885_v55  ;;  %1742 = vrot.lane.b32.xlu0 %v1729_v44, %s4664_s17  ;;  %v1728_v48 = vsel %vm1720_vm6, %v1716_v34, %v1724_v45 }
0x14fd   :  { %v1727_v51 = vmul.f32 0.1, %v1719_v43  ;;  %vm1723_vm8 = vcmp.ge.f32.partialorder %v1719_v43, 0.0  ;;  %v4328_v62 = vpack.i.bf16 %v1729_v44, %v1728_v48 }
0x14fe   :  { %v4914_v47 = vpack.c.bf16 %v1719_v43, %v1718_v46  ;;  %v1726_v49 = vmul.f32 0.1, %v1718_v46  ;;  %vm1722_vm7 = vcmp.ge.f32.partialorder %v1718_v46, 0.0 }
0x14ff   :  { %v1731_v52 = vsel %vm1723_vm8, %v1719_v43, %v1727_v51  ;;  %v1734_v51 = vld [vmem:[#allocation4 + $0xb0] sm:$0xff] }
0x1500   :  { %1739 = vrot.lane.b32.xlu0 %v1728_v48, %s4664_s17  ;;  %v1730_v50 = vsel %vm1722_vm7, %v1718_v46, %v1726_v49  ;;  %v1735_v46 = vld [vmem:[#allocation4 + $0xb8] sm:$0xff] }
0x1501   :  { %v4333_v55 = vpack.i.bf16 %v1731_v52, %v1730_v50 }
0x1504   :  { %1745 = vrot.lane.b32.xlu0 %v1730_v50, %s4664_s17 }
0x1508   :  { %1748 = vrot.lane.b32.xlu0 %v1731_v52, %s4664_s17 }
0x150c   :  { %1780 = vrot.lane.b32.xlu0 %v3323_v53, %s4651_s8 }
0x156e   :  { %v1743_v32 = vpop.permute.xlu0 %1742 }
0x156f   :  { %v1744_v54 = vsel %vm1738_vm9, %v1743_v32, %v1729_v44 }
0x1570   :  { %1753 = vrot.lane.b32.xlu1 %v1744_v54, %s4664_s17 }
0x1572   :  { %v1740_v35 = vpop.permute.xlu0 %1739 }
0x1573   :  { %v1741_v56 = vsel %vm1738_vm9, %v1740_v35, %v1728_v48 }
0x1574   :  { %4334 = vrot.lane.b32.xlu1 %v4333_v55, %s4665_s18  ;;  %1751 = vrot.lane.b32.xlu0 %v1741_v56, %s4664_s17 }
0x1576   :  { %v1746_v57 = vpop.permute.xlu0 %1745 }
0x1577   :  { %v1747_v58 = vsel %vm1738_vm9, %v1746_v57, %v1730_v50 }
0x1578   :  { %1755 = vrot.lane.b32.xlu0 %v1747_v58, %s4664_s17 }
0x157a   :  { %v1749_v59 = vpop.permute.xlu0 %1748 }
0x157b   :  { %v1750_v60 = vsel %vm1738_vm9, %v1749_v59, %v1731_v52 }
0x157c   :  { %1757 = vrot.lane.b32.xlu0 %v1750_v60, %s4664_s17 }
0x157e   :  { %v4931_v38 = vpop.permute.xlu0 %1780 }
0x1580   :  { %1768 = vrot.lane.b32.xlu0 %v3322_v61, %s4665_s18 }
0x1584   :  { %4329 = vrot.lane.b32.xlu0 %v4328_v62, %s4665_s18 }
0x15e2   :  { %v1754_v63 = vpop.permute.xlu1 %1753 }
0x15e3   :  { %v1760_v0 = vsel %vm1738_vm9, %v1754_v63, %v1729_v44  ;;  %v1733_v44 = vld [vmem:[#allocation4 + $0xa8] sm:$0xff] }
0x15e4   :  { %v1784_v6 = vmul.f32 %v4931_v38, %v1760_v0 }
0x15e6   :  { %v1752_v2 = vpop.permute.xlu0 %1751  ;;  %v4335_v16 = vpop.permute.xlu1 %4334 }
0x15e7   :  { %v1759_v4 = vsel %vm1738_vm9, %v1752_v2, %v1728_v48 }
0x15e8   :  { %v1783_v5 = vmul.f32 %v4931_v38, %v1759_v4 }
0x15ea   :  { %v1756_v7 = vpop.permute.xlu0 %1755  ;;  %v4338_v8 = vpack.i.bf16 %v1784_v6, %v1783_v5 }
0x15eb   :  { %v1761_v9 = vsel %vm1738_vm9, %v1756_v7, %v1730_v50 }
0x15ec   :  { %4339 = vrot.lane.b32.xlu0 %v4338_v8, %s4666_s19  ;;  %v1785_v12 = vmul.f32 %v4931_v38, %v1761_v9 }
0x15ee   :  { %v1758_v10 = vpop.permute.xlu0 %1757 }
0x15ef   :  { %v1762_v11 = vsel %vm1738_vm9, %v1758_v10, %v1731_v52 }
0x15f0   :  { %v1786_v13 = vmul.f32 %v4931_v38, %v1762_v11 }
0x15f2   :  { %v4942_v14 = vpop.permute.xlu0 %1768  ;;  %v4343_v15 = vpack.i.bf16 %v1786_v13, %v1785_v12 }
0x15f3   :  { %v1771_v17 = vmul.f32 %v4942_v14, %v1759_v4  ;;  %v1772_v18 = vmul.f32 %v4942_v14, %v1760_v0  ;;  %v1773_v19 = vmul.f32 %v4942_v14, %v1761_v9  ;;  %v1774_v20 = vmul.f32 %v4942_v14, %v1762_v11 }
0x15f4   :  { %4344 = vrot.lane.b32.xlu1 %v4343_v15, %s4666_s19 }
0x15f5   :  { %v4348_v21 = vpack.i.bf16 %v1772_v18, %v1771_v17  ;;  %v4353_v23 = vpack.i.bf16 %v1774_v20, %v1773_v19 }
0x15f6   :  { %v4330_v24 = vpop.permute.xlu0 %4329 }
0x15f7   :  { %4349 = vrot.lane.b32.xlu0 %v4348_v21, %s4667_s20 }
0x15f8   :  { %4354 = vrot.lane.b32.xlu1 %v4353_v23, %s4667_s20 }
0x15fb   :  { %4359 = vrot.lane.b32.xlu0 %v4330_v24, %s4667_s20 }
0x15fc   :  { %4364 = vrot.lane.b32.xlu1 %v4335_v16, %s4667_s20 }
0x165e   :  { %v4340_v25 = vpop.permute.xlu0 %4339 }
0x165f   :  { %4369 = vrot.lane.b32.xlu0 %v4340_v25, %s4667_s20 }
0x1663   :  { %1813 = vperm.xlu0 %4378, %v1732_v26  }
0x1666   :  { %v4345_v27 = vpop.permute.xlu1 %4344 }
0x1667   :  { %4374 = vrot.lane.b32.xlu1 %v4345_v27, %s4667_s20  ;;  %1828 = vperm.xlu0 %4378, %v1735_v46  }
0x1669   :  { %v4350_v28 = vpop.permute.xlu0 %4349 }
0x166a   :  { %v4352_v29 = vunpack.i.h.bf16 %v4350_v28  ;;  %v4351_v30 = vunpack.i.l.bf16 %v4350_v28  ;;  %v4355_v31 = vpop.permute.xlu1 %4354 }
0x166b   :  { %v4357_v33 = vunpack.i.h.bf16 %v4355_v31  ;;  %v4356_v34 = vunpack.i.l.bf16 %v4355_v31  ;;  %1818 = vperm.xlu1 %4379, %v1733_v44  }
0x166c   :  { %v4045_v41 = vpack.c.bf16 %v4352_v29, %v4351_v30 }
0x166d   :  { %v4360_v37 = vpop.permute.xlu0 %4359  ;;  %v4049_v39 = vpack.c.bf16 %v4357_v33, %v4356_v34  ;;  %v1977_v33 = vld [vmem:[#allocation4 + $0xc0] sm:$0xff] }
0x166e   :  { %v4362_v40 = vunpack.i.h.bf16 %v4360_v37  ;;  %v4361_v43 = vunpack.i.l.bf16 %v4360_v37  ;;  %4046 = vmatprep.subr.bf16.mxu0 %v4045_v41  ;;  %v4365_v45 = vpop.permute.xlu1 %4364  ;;  %3798 = vmatprep.mubr.msk.f32.mxu1 %vm1871_vm10, %v1977_v33 }
0x166f   :  { %4048 = vmatpush3.bf16.msra.mxu0 %v4045_v41  ;;  %v4367_v49 = vunpack.i.h.bf16 %v4365_v45  ;;  %v4366_v50 = vunpack.i.l.bf16 %v4365_v45  ;;  %1823 = vperm.xlu1 %4379, %v1734_v51  }
0x1670   :  { %4050 = vmatprep.subr.bf16.mxu0 %v4049_v39  ;;  %v4053_v48 = vpack.c.bf16 %v4362_v40, %v4361_v43 }
0x1671   :  { %v4057_v52 = vpack.c.bf16 %v4367_v49, %v4366_v50 }
0x1673   :  { %4052 = vmatpush3.bf16.msra.mxu0 %v4049_v39 }
0x1674   :  { %4054 = vmatprep.subr.bf16.mxu0 %v4053_v48 }
0x1677   :  { %4056 = vmatpush3.bf16.msra.mxu0 %v4053_v48 }
0x1678   :  { %4058 = vmatprep.subr.bf16.mxu0 %v4057_v52 }
0x167b   :  { %4060 = vmatpush3.bf16.msra.mxu0 %v4057_v52 }
0x16d1   :  { %v4370_v53 = vpop.permute.xlu0 %4369 }
0x16d2   :  { %v4372_v32 = vunpack.i.h.bf16 %v4370_v53  ;;  %v4371_v54 = vunpack.i.l.bf16 %v4370_v53 }
0x16d4   :  { %v4061_v35 = vpack.c.bf16 %v4372_v32, %v4371_v54 }
0x16d6   :  { %4062 = vmatprep.subr.bf16.mxu0 %v4061_v35 }
0x16d7   :  { %4064 = vmatpush3.bf16.msra.mxu0 %v4061_v35 }
0x16d9   :  { %v4375_v55 = vpop.permute.xlu1 %4374 }
0x16da   :  { %v4377_v56 = vunpack.i.h.bf16 %v4375_v55  ;;  %v4376_v57 = vunpack.i.l.bf16 %v4375_v55 }
0x16dc   :  { %v4065_v58 = vpack.c.bf16 %v4377_v56, %v4376_v57 }
0x16de   :  { %4066 = vmatprep.subr.bf16.mxu0 %v4065_v58 }
0x16df   :  { %4068 = vmatpush3.bf16.msra.mxu0 %v4065_v58 }
0x16e2   :  { %3769 = vmatmul.mubr.msk.f32.vlgmr.msra.gmra.mrb[14].mxu0 %vm1871_vm10, %v1733_v44  ;;  %v1814_v59 = vpop.permute.xlu0 %1813 }
0x16e3   :  { %3771 = vmatprep.mubr.msk.f32.mxu0 %vm1871_vm10, %v1734_v51 }
0x16e6   :  { %3772 = vmatmul.mubr.msk.f32.gmra.mrb[16].mxu0 %vm1871_vm10, %v1735_v46  ;;  %v1829_v4 = vpop.permute.xlu0 %1828 }
0x16ea   :  { %v1819_v60 = vpop.permute.xlu1 %1818 }
0x16ee   :  { %v1824_v7 = vpop.permute.xlu1 %1823 }
0x17b5   :  { %v3770_v61 = vpop.f32.mrb[14].mxu0 }
0x17b6   :  { %v1952_v62 = vadd.f32 %v3770_v61, %v1819_v60  ;;  %v1946_v63 = vpop.f32.mrb[15].mxu0 }
0x17b7   :  { %v1947_v0 = vadd.f32 %v1946_v63, %v1814_v59 }
0x17b8   :  { %vm1966_vm11 = vcmp.ge.f32.partialorder %v1952_v62, 0.0  ;;  %v1970_v2 = vmul.f32 0.1, %v1952_v62 }
0x17b9   :  { %vm1965_vm12 = vcmp.ge.f32.partialorder %v1947_v0, 0.0  ;;  %v1969_v5 = vmul.f32 0.1, %v1947_v0  ;;  %v3773_v6 = vpop.f32.mrb[16].mxu0 }
0x17ba   :  { %v1962_v8 = vadd.f32 %v3773_v6, %v1829_v4  ;;  %v1956_v9 = vpop.f32.mrb[17].mxu0  ;;  %v1974_v10 = vsel %vm1966_vm11, %v1952_v62, %v1970_v2  ;;  %v1978_v4 = vld [vmem:[#allocation4 + $0xc8] sm:$0xff] }
0x17bb   :  { %v1957_v11 = vadd.f32 %v1956_v9, %v1824_v7  ;;  %1984 = vrot.lane.b32.xlu0 %v1974_v10, %s4664_s17  ;;  %v1973_v12 = vsel %vm1965_vm12, %v1947_v0, %v1969_v5 }
0x17bc   :  { %vm1968_vm13 = vcmp.ge.f32.partialorder %v1962_v8, 0.0  ;;  %v1972_v13 = vmul.f32 0.1, %v1962_v8  ;;  %1981 = vrot.lane.b32.xlu1 %v1973_v12, %s4664_s17  ;;  %v4380_v28 = vpack.i.bf16 %v1974_v10, %v1973_v12 }
0x17bd   :  { %vm1967_vm14 = vcmp.ge.f32.partialorder %v1957_v11, 0.0  ;;  %v1971_v15 = vmul.f32 0.1, %v1957_v11 }
0x17be   :  { %v1976_v16 = vsel %vm1968_vm13, %v1962_v8, %v1972_v13  ;;  %v1979_v13 = vld [vmem:[#allocation4 + $0xd0] sm:$0xff] }
0x17bf   :  { %1990 = vrot.lane.b32.xlu0 %v1976_v16, %s4664_s17  ;;  %v1975_v17 = vsel %vm1967_vm14, %v1957_v11, %v1971_v15  ;;  %v2315_v15 = vld [vmem:[#allocation4 + $0x188] sm:$0xff]  ;;  %vm3273_vm14 = vcmask 28672  }
0x17c0   :  { %1987 = vrot.lane.b32.xlu1 %v1975_v17, %s4664_s17  ;;  %v4385_v27 = vpack.i.bf16 %v1976_v16, %v1975_v17 }
0x182d   :  { %v1985_v18 = vpop.permute.xlu0 %1984 }
0x182e   :  { %v1982_v19 = vpop.permute.xlu1 %1981  ;;  %v1986_v20 = vsel %vm1738_vm9, %v1985_v18, %v1974_v10  ;;  %v2192_v18 = vld [vmem:[#allocation4 + $0xf0] sm:$0xff] }
0x182f   :  { %1995 = vrot.lane.b32.xlu0 %v1986_v20, %s4664_s17  ;;  %v1983_v21 = vsel %vm1738_vm9, %v1982_v19, %v1973_v12  ;;  %v1980_v19 = vld [vmem:[#allocation4 + $0xd8] sm:$0xff] }
0x1830   :  { %1993 = vrot.lane.b32.xlu1 %v1983_v21, %s4664_s17  ;;  %v2193_v20 = vld [vmem:[#allocation4 + $0xf8] sm:$0xff] }
0x1831   :  { %v1991_v23 = vpop.permute.xlu0 %1990 }
0x1832   :  { %v1992_v24 = vsel %vm1738_vm9, %v1991_v23, %v1976_v16  ;;  %v1988_v25 = vpop.permute.xlu1 %1987 }
0x1833   :  { %1999 = vrot.lane.b32.xlu0 %v1992_v24, %s4664_s17  ;;  %v1989_v26 = vsel %vm1738_vm9, %v1988_v25, %v1975_v17 }
0x1834   :  { %1997 = vrot.lane.b32.xlu1 %v1989_v26, %s4664_s17 }
0x1837   :  { %4386 = vrot.lane.b32.xlu0 %v4385_v27, %s4665_s18 }
0x1838   :  { %4381 = vrot.lane.b32.xlu1 %v4380_v28, %s4665_s18 }
0x18a1   :  { %v1996_v29 = vpop.permute.xlu0 %1995 }
0x18a2   :  { %v2002_v30 = vsel %vm1738_vm9, %v1996_v29, %v1974_v10  ;;  %v1994_v31 = vpop.permute.xlu1 %1993  ;;  %v2190_v10 = vld [vmem:[#allocation4 + $0xe0] sm:$0xff] }
0x18a3   :  { %v2010_v34 = vmul.f32 %v2002_v30, %v4931_v38  ;;  %v2001_v41 = vsel %vm1738_vm9, %v1994_v31, %v1973_v12  ;;  %v2006_v40 = vmul.f32 %v2002_v30, %v4942_v14  ;;  %v2191_v12 = vld [vmem:[#allocation4 + $0xe8] sm:$0xff] }
0x18a4   :  { %v2009_v37 = vmul.f32 %v2001_v41, %v4931_v38  ;;  %v2005_v43 = vmul.f32 %v2001_v41, %v4942_v14 }
0x18a5   :  { %v2000_v39 = vpop.permute.xlu0 %1999 }
0x18a6   :  { %v2004_v44 = vsel %vm1738_vm9, %v2000_v39, %v1976_v16  ;;  %v1998_v45 = vpop.permute.xlu1 %1997  ;;  %v4390_v46 = vpack.i.bf16 %v2010_v34, %v2009_v37  ;;  %v4400_v54 = vpack.i.bf16 %v2006_v40, %v2005_v43  ;;  %v2316_v16 = vld [vmem:[#allocation4 + $0x190] sm:$0xff] }
0x18a7   :  { %v2012_v48 = vmul.f32 %v2004_v44, %v4931_v38  ;;  %v2003_v49 = vsel %vm1738_vm9, %v1998_v45, %v1975_v17  ;;  %v2008_v51 = vmul.f32 %v2004_v44, %v4942_v14  ;;  %v4101_v17 = vpack.c.bf16 %v2316_v16, %v2315_v15 }
0x18a8   :  { %v2011_v50 = vmul.f32 %v2003_v49, %v4931_v38  ;;  %4391 = vrot.lane.b32.xlu1 %v4390_v46, %s4666_s19  ;;  %v2007_v53 = vmul.f32 %v2003_v49, %v4942_v14 }
0x18a9   :  { %v4387_v35 = vpop.permute.xlu0 %4386  ;;  %4102 = vmatprep.subr.bf16.mxu0 %v4101_v17 }
0x18aa   :  { %v4395_v52 = vpack.i.bf16 %v2012_v48, %v2011_v50  ;;  %v4382_v32 = vpop.permute.xlu1 %4381  ;;  %v4405_v55 = vpack.i.bf16 %v2008_v51, %v2007_v53  ;;  %4104 = vmatpush3.bf16.msra.mxu0 %v4101_v17 }
0x18ac   :  { %4401 = vrot.lane.b32.xlu1 %v4400_v54, %s4667_s20  ;;  %4396 = vrot.lane.b32.xlu0 %v4395_v52, %s4666_s19 }
0x18b0   :  { %4406 = vrot.lane.b32.xlu0 %v4405_v55, %s4667_s20  ;;  %4411 = vrot.lane.b32.xlu1 %v4382_v32, %s4667_s20 }
0x18b4   :  { %4416 = vrot.lane.b32.xlu0 %v4387_v35, %s4667_s20 }
0x191a   :  { %v4392_v38 = vpop.permute.xlu1 %4391 }
0x191b   :  { %4421 = vrot.lane.b32.xlu1 %v4392_v38, %s4667_s20 }
0x191e   :  { %v4397_v56 = vpop.permute.xlu0 %4396  ;;  %v4402_v57 = vpop.permute.xlu1 %4401 }
0x191f   :  { %v4404_v58 = vunpack.i.h.bf16 %v4402_v57  ;;  %v4403_v59 = vunpack.i.l.bf16 %v4402_v57  ;;  %4426 = vrot.lane.b32.xlu0 %v4397_v56, %s4667_s20  ;;  %2039 = vperm.xlu1 %4379, %v1977_v33  }
0x1921   :  { %v4069_v14 = vpack.c.bf16 %v4404_v58, %v4403_v59 }
0x1922   :  { %v4407_v60 = vpop.permute.xlu0 %4406  ;;  %v4412_v61 = vpop.permute.xlu1 %4411 }
0x1923   :  { %v4409_v62 = vunpack.i.h.bf16 %v4407_v60  ;;  %v4408_v63 = vunpack.i.l.bf16 %v4407_v60  ;;  %v4414_v0 = vunpack.i.h.bf16 %v4412_v61  ;;  %v4413_v2 = vunpack.i.l.bf16 %v4412_v61  ;;  %4070 = vmatprep.subr.bf16.mxu1 %v4069_v14  ;;  %2044 = vperm.xlu0 %4378, %v1978_v4  }
0x1924   :  { %4072 = vmatpush3.bf16.msra.mxu1 %v4069_v14  ;;  %4430 = vset.pattern.permute.xlu1 %v4663_v22 }
0x1925   :  { %v4073_v5 = vpack.c.bf16 %v4409_v62, %v4408_v63  ;;  %v4077_v7 = vpack.c.bf16 %v4414_v0, %v4413_v2  ;;  %2296 = vperm.xlu1 %4430, %v2190_v10   ;;  %v3341_v0 = vld [vmem:[#allocation4 + $0x229] ss:$0 sm:$0xff] }
0x1926   :  { %v4417_v6 = vpop.permute.xlu0 %4416 }
0x1927   :  { %v4419_v8 = vunpack.i.h.bf16 %v4417_v6  ;;  %v4418_v9 = vunpack.i.l.bf16 %v4417_v6  ;;  %4074 = vmatprep.subr.bf16.mxu1 %v4073_v5  ;;  %4431 = vset.pattern.permute.xlu0 %v4663_v22 }
0x1928   :  { %4076 = vmatpush3.bf16.msra.mxu1 %v4073_v5  ;;  %2300 = vperm.xlu0 %4431, %v2191_v12  }
0x1929   :  { %4078 = vmatprep.subr.bf16.mxu1 %v4077_v7  ;;  %v4081_v11 = vpack.c.bf16 %v4419_v8, %v4418_v9  ;;  %4432 = vset.pattern.permute.xlu1 %v4668_v36 }
0x192a   :  { %2049 = vperm.xlu1 %4432, %v1979_v13  }
0x192c   :  { %4080 = vmatpush3.bf16.msra.mxu1 %v4077_v7  ;;  %2304 = vperm.xlu0 %4431, %v2192_v18  }
0x192d   :  { %4082 = vmatprep.subr.bf16.mxu1 %v4081_v11 }
0x192e   :  { %2054 = vperm.xlu1 %4432, %v1980_v19  }
0x1930   :  { %4084 = vmatpush3.bf16.msra.mxu1 %v4081_v11  ;;  %4484 = vset.pattern.permute.xlu0 %v4668_v36  ;;  %v3340_v11 = vld [vmem:[#allocation4 + $0x228] ss:$0 sm:$0xff] }
0x1932   :  { %4433 = vset.pattern.permute.xlu1 %v4663_v22 }
0x1933   :  { %2308 = vperm.xlu1 %4433, %v2193_v20  }
0x1937   :  { %4485 = vset.pattern.permute.xlu1 %v4668_v36 }
0x198d   :  { %v4422_v21 = vpop.permute.xlu1 %4421 }
0x198e   :  { %v4424_v23 = vunpack.i.h.bf16 %v4422_v21  ;;  %v4423_v24 = vunpack.i.l.bf16 %v4422_v21 }
0x1990   :  { %v4085_v25 = vpack.c.bf16 %v4424_v23, %v4423_v24 }
0x1991   :  { %v4427_v26 = vpop.permute.xlu0 %4426 }
0x1992   :  { %v4429_v27 = vunpack.i.h.bf16 %v4427_v26  ;;  %v4428_v28 = vunpack.i.l.bf16 %v4427_v26  ;;  %4086 = vmatprep.subr.bf16.mxu1 %v4085_v25 }
0x1993   :  { %4088 = vmatpush3.bf16.msra.mxu1 %v4085_v25 }
0x1994   :  { %v4089_v29 = vpack.c.bf16 %v4429_v27, %v4428_v28 }
0x1996   :  { %4090 = vmatprep.subr.bf16.mxu1 %v4089_v29 }
0x1997   :  { %4092 = vmatpush3.bf16.msra.mxu1 %v4089_v29 }
0x1998   :  { %4094 = vmatprep.subr.bf16.mxu1 %v4909_v42 }
0x199a   :  { %3799 = vmatmul.mubr.msk.f32.vlgmr.msra.gmra.mrb[18].mxu1 %vm1871_vm10, %v1978_v4 }
0x199b   :  { %4096 = vmatpush3.bf16.msra.mxu1 %v4909_v42  ;;  %3801 = vmatprep.mubr.msk.f32.mxu1 %vm1871_vm10, %v1979_v13 }
0x199c   :  { %4098 = vmatprep.subr.bf16.mxu1 %v4914_v47 }
0x199e   :  { %3802 = vmatmul.mubr.msk.f32.gmra.mrb[20].mxu1 %vm1871_vm10, %v1980_v19  ;;  %v2040_v30 = vpop.permute.xlu1 %2039 }
0x199f   :  { %4100 = vmatpush3.bf16.msra.mxu1 %v4914_v47  ;;  %3812 = vmatprep.mubr.msk.f32.mxu1 %vm1291_vm3, %v2190_v10 }
0x19a2   :  { %3813 = vmatmul.mubr.msk.f32.vlgmr.msra.gmra.mrb[18].mxu1 %vm1291_vm3, %v2191_v12  ;;  %v2045_v42 = vpop.permute.xlu0 %2044 }
0x19a3   :  { %3815 = vmatprep.mubr.msk.f32.mxu1 %vm1291_vm3, %v2192_v18 }
0x19a4   :  { %v2297_v31 = vpop.permute.xlu1 %2296 }
0x19a6   :  { %3816 = vmatmul.mubr.msk.f32.gmra.mrb[20].mxu1 %vm1291_vm3, %v2193_v20 }
0x19a7   :  { %v2301_v41 = vpop.permute.xlu0 %2300 }
0x19a9   :  { %v2050_v33 = vpop.permute.xlu1 %2049 }
0x19ab   :  { %v2305_v51 = vpop.permute.xlu0 %2304 }
0x19ad   :  { %v2055_v40 = vpop.permute.xlu1 %2054 }
0x19b2   :  { %v2309_v50 = vpop.permute.xlu1 %2308 }
0x1a75   :  { %v3814_v34 = vpop.f32.mrb[18].mxu1 }
0x1a76   :  { %v4197_v37 = vadd.f32 %v3814_v34, %v2045_v42  ;;  %v2272_v39 = vpop.f32.mrb[19].mxu1 }
0x1a77   :  { %v4198_v43 = vadd.f32 %v2272_v39, %v2040_v30 }
0x1a78   :  { %v2312_v45 = vadd.f32 %v4197_v37, %v2301_v41 }
0x1a79   :  { %v2311_v44 = vadd.f32 %v4198_v43, %v2297_v31  ;;  %v3817_v47 = vpop.f32.mrb[20].mxu1 }
0x1a7a   :  { %v4199_v46 = vadd.f32 %v3817_v47, %v2055_v40  ;;  %v2282_v48 = vpop.f32.mrb[21].mxu1  ;;  %v2426_v47 = vld [vmem:[#allocation4 + $0x100] sm:$0xff] }
0x1a7b   :  { %v4200_v49 = vadd.f32 %v2282_v48, %v2050_v33  ;;  %3822 = vmatprep.mubr.msk.f32.mxu0 %vm1165_vm2, %v2311_v44 }
0x1a7c   :  { %3823 = vmatmul.mubr.msk.f32.vlgmr.msra.gmra.mrb[18].mxu0 %vm1165_vm2, %v2312_v45  ;;  %v2314_v53 = vadd.f32 %v4199_v46, %v2309_v50 }
0x1a7d   :  { %v2313_v52 = vadd.f32 %v4200_v49, %v2305_v51 }
0x1a7f   :  { %3825 = vmatprep.mubr.msk.f32.mxu0 %vm1165_vm2, %v2313_v52 }
0x1a80   :  { %3826 = vmatmul.mubr.msk.f32.gmra.mrb[20].mxu0 %vm1165_vm2, %v2314_v53 }
0x1a81   :  { %3852 = vmatprep.mubr.msk.f32.mxu0 %vm1871_vm10, %v2426_v47 }
0x1b4f   :  { %v3824_v32 = vpop.f32.mrb[18].mxu0 }
0x1b50   :  { %v2419_v54 = vmul.f32 0.1, %v3824_v32  ;;  %v2395_v35 = vpop.f32.mrb[19].mxu0  ;;  %vm2415_vm15 = vcmp.ge.f32.partialorder %v3824_v32, 0.0 }
0x1b51   :  { %v2418_v55 = vmul.f32 0.1, %v2395_v35  ;;  %vm2414_vm0 = vcmp.ge.f32.partialorder %v2395_v35, 0.0  ;;  %v5017_v38 = vpack.c.bf16 %v3824_v32, %v2395_v35 }
0x1b52   :  { %v2423_v56 = vsel %vm2415_vm15, %v3824_v32, %v2419_v54 }
0x1b53   :  { %2436 = vrot.lane.b32.xlu1 %v2423_v56, %s4645_s5  ;;  %v3827_v57 = vpop.f32.mrb[20].mxu0  ;;  %v2422_v58 = vsel %vm2414_vm0, %v2395_v35, %v2418_v55 }
0x1b54   :  { %v2421_v59 = vmul.f32 0.1, %v3827_v57  ;;  %2433 = vrot.lane.b32.xlu0 %v2422_v58, %s4645_s5  ;;  %v2405_v14 = vpop.f32.mrb[21].mxu0  ;;  %vm2417_vm4 = vcmp.ge.f32.partialorder %v3827_v57, 0.0  ;;  %v4434_v12 = vpack.i.bf16 %v2423_v56, %v2422_v58 }
0x1b55   :  { %v2420_v60 = vmul.f32 0.1, %v2405_v14  ;;  %vm2416_vm2 = vcmp.ge.f32.partialorder %v2405_v14, 0.0  ;;  %v5021_v61 = vpack.c.bf16 %v3827_v57, %v2405_v14 }
0x1b56   :  { %v2425_v62 = vsel %vm2417_vm4, %v3827_v57, %v2421_v59 }
0x1b57   :  { %2442 = vrot.lane.b32.xlu1 %v2425_v62, %s4645_s5  ;;  %v2424_v63 = vsel %vm2416_vm2, %v2405_v14, %v2420_v60 }
0x1b58   :  { %2439 = vrot.lane.b32.xlu0 %v2424_v63, %s4645_s5  ;;  %v4439_v13 = vpack.i.bf16 %v2425_v62, %v2424_v63 }
0x1b5c   :  { %2474 = vrot.lane.b32.xlu0 %v3341_v0, %s4651_s8 }
0x1bc5   :  { %v2437_v2 = vpop.permute.xlu1 %2436 }
0x1bc6   :  { %v2434_v4 = vpop.permute.xlu0 %2433  ;;  %v2438_v5 = vsel %vm2432_vm5, %v2437_v2, %v2423_v56 }
0x1bc7   :  { %2447 = vrot.lane.b32.xlu1 %v2438_v5, %s4645_s5  ;;  %v2435_v6 = vsel %vm2432_vm5, %v2434_v4, %v2422_v58 }
0x1bc8   :  { %2445 = vrot.lane.b32.xlu0 %v2435_v6, %s4645_s5 }
0x1bc9   :  { %v2443_v7 = vpop.permute.xlu1 %2442 }
0x1bca   :  { %v2440_v8 = vpop.permute.xlu0 %2439  ;;  %v2444_v9 = vsel %vm2432_vm5, %v2443_v7, %v2425_v62 }
0x1bcb   :  { %v2441_v10 = vsel %vm2432_vm5, %v2440_v8, %v2424_v63 }
0x1bcc   :  { %2451 = vrot.lane.b32.xlu0 %v2444_v9, %s4645_s5  ;;  %2449 = vrot.lane.b32.xlu1 %v2441_v10, %s4645_s5 }
0x1bce   :  { %v5037_v15 = vpop.permute.xlu0 %2474 }
0x1bd0   :  { %4435 = vrot.lane.b32.xlu0 %v4434_v12, %s4669_s21  ;;  %2462 = vrot.lane.b32.xlu1 %v3340_v11, %s4669_s21 }
0x1bd4   :  { %4440 = vrot.lane.b32.xlu1 %v4439_v13, %s4669_s21 }
0x1c39   :  { %v2448_v16 = vpop.permute.xlu1 %2447 }
0x1c3a   :  { %v2454_v17 = vsel %vm2432_vm5, %v2448_v16, %v2423_v56  ;;  %v2446_v18 = vpop.permute.xlu0 %2445  ;;  %v2427_v56 = vld [vmem:[#allocation4 + $0x108] sm:$0xff] }
0x1c3b   :  { %v2478_v19 = vmul.f32 %v5037_v15, %v2454_v17  ;;  %v2453_v20 = vsel %vm2432_vm5, %v2446_v18, %v2422_v58  ;;  %v2429_v58 = vld [vmem:[#allocation4 + $0x118] sm:$0xff] }
0x1c3c   :  { %v2477_v21 = vmul.f32 %v5037_v15, %v2453_v20 }
0x1c3e   :  { %v4444_v23 = vpack.i.bf16 %v2478_v19, %v2477_v21  ;;  %v2450_v24 = vpop.permute.xlu1 %2449  ;;  %v2452_v25 = vpop.permute.xlu0 %2451 }
0x1c3f   :  { %v2455_v26 = vsel %vm2432_vm5, %v2450_v24, %v2424_v63  ;;  %v2456_v27 = vsel %vm2432_vm5, %v2452_v25, %v2425_v62  ;;  %v2428_v62 = vld [vmem:[#allocation4 + $0x110] sm:$0xff] }
0x1c40   :  { %v2479_v28 = vmul.f32 %v5037_v15, %v2455_v26  ;;  %v2480_v29 = vmul.f32 %v5037_v15, %v2456_v27  ;;  %4445 = vrot.lane.b32.xlu0 %v4444_v23, %s4670_s22 }
0x1c42   :  { %v4449_v30 = vpack.i.bf16 %v2480_v29, %v2479_v28  ;;  %v5048_v31 = vpop.permute.xlu1 %2462  ;;  %v4436_v33 = vpop.permute.xlu0 %4435 }
0x1c43   :  { %v2465_v42 = vmul.f32 %v5048_v31, %v2453_v20  ;;  %v2466_v34 = vmul.f32 %v5048_v31, %v2454_v17  ;;  %v2467_v41 = vmul.f32 %v5048_v31, %v2455_v26  ;;  %v2468_v37 = vmul.f32 %v5048_v31, %v2456_v27 }
0x1c44   :  { %4450 = vrot.lane.b32.xlu1 %v4449_v30, %s4670_s22 }
0x1c45   :  { %v4454_v39 = vpack.i.bf16 %v2466_v34, %v2465_v42  ;;  %v4459_v43 = vpack.i.bf16 %v2468_v37, %v2467_v41 }
0x1c46   :  { %v4441_v40 = vpop.permute.xlu1 %4440 }
0x1c47   :  { %4455 = vrot.lane.b32.xlu0 %v4454_v39, %s4671_s23 }
0x1c48   :  { %4460 = vrot.lane.b32.xlu1 %v4459_v43, %s4671_s23 }
0x1c4b   :  { %4465 = vrot.lane.b32.xlu0 %v4436_v33, %s4671_s23 }
0x1c4c   :  { %4470 = vrot.lane.b32.xlu1 %v4441_v40, %s4671_s23 }
0x1cb2   :  { %v4446_v44 = vpop.permute.xlu0 %4445 }
0x1cb3   :  { %4475 = vrot.lane.b32.xlu0 %v4446_v44, %s4671_s23 }
0x1cb6   :  { %v4451_v45 = vpop.permute.xlu1 %4450 }
0x1cb7   :  { %4480 = vrot.lane.b32.xlu1 %v4451_v45, %s4671_s23  ;;  %2507 = vperm.xlu0 %4484, %v2426_v47  }
0x1cb9   :  { %v4456_v46 = vpop.permute.xlu0 %4455 }
0x1cba   :  { %v4458_v48 = vunpack.i.h.bf16 %v4456_v46  ;;  %v4457_v49 = vunpack.i.l.bf16 %v4456_v46  ;;  %v4461_v50 = vpop.permute.xlu1 %4460 }
0x1cbb   :  { %v4463_v51 = vunpack.i.h.bf16 %v4461_v50  ;;  %v4462_v52 = vunpack.i.l.bf16 %v4461_v50  ;;  %2512 = vperm.xlu1 %4485, %v2427_v56   ;;  %2522 = vperm.xlu0 %4484, %v2429_v58  }
0x1cbc   :  { %v4105_v53 = vpack.c.bf16 %v4458_v48, %v4457_v49 }
0x1cbd   :  { %v4109_v32 = vpack.c.bf16 %v4463_v51, %v4462_v52  ;;  %v4466_v54 = vpop.permute.xlu0 %4465 }
0x1cbe   :  { %v4468_v35 = vunpack.i.h.bf16 %v4466_v54  ;;  %v4467_v55 = vunpack.i.l.bf16 %v4466_v54  ;;  %4106 = vmatprep.subr.bf16.mxu0 %v4105_v53  ;;  %v4471_v57 = vpop.permute.xlu1 %4470 }
0x1cbf   :  { %4108 = vmatpush3.bf16.msra.mxu0 %v4105_v53  ;;  %v4473_v14 = vunpack.i.h.bf16 %v4471_v57  ;;  %v4472_v60 = vunpack.i.l.bf16 %v4471_v57  ;;  %2517 = vperm.xlu1 %4485, %v2428_v62   ;;  %v2670_v53 = vld [vmem:[#allocation4 + $0x120] sm:$0xff] }
0x1cc0   :  { %4110 = vmatprep.subr.bf16.mxu0 %v4109_v32  ;;  %v4113_v59 = vpack.c.bf16 %v4468_v35, %v4467_v55  ;;  %3882 = vmatprep.mubr.msk.f32.mxu1 %vm1871_vm10, %v2670_v53 }
0x1cc1   :  { %v4117_v63 = vpack.c.bf16 %v4473_v14, %v4472_v60 }
0x1cc3   :  { %4112 = vmatpush3.bf16.msra.mxu0 %v4109_v32 }
0x1cc4   :  { %4114 = vmatprep.subr.bf16.mxu0 %v4113_v59 }
0x1cc7   :  { %4116 = vmatpush3.bf16.msra.mxu0 %v4113_v59 }
0x1cc8   :  { %4118 = vmatprep.subr.bf16.mxu0 %v4117_v63 }
0x1ccb   :  { %4120 = vmatpush3.bf16.msra.mxu0 %v4117_v63 }
0x1d25   :  { %v4476_v0 = vpop.permute.xlu0 %4475 }
0x1d26   :  { %v4478_v2 = vunpack.i.h.bf16 %v4476_v0  ;;  %v4477_v4 = vunpack.i.l.bf16 %v4476_v0 }
0x1d28   :  { %v4121_v5 = vpack.c.bf16 %v4478_v2, %v4477_v4 }
0x1d29   :  { %v4481_v6 = vpop.permute.xlu1 %4480 }
0x1d2a   :  { %v4483_v7 = vunpack.i.h.bf16 %v4481_v6  ;;  %v4482_v8 = vunpack.i.l.bf16 %v4481_v6  ;;  %4122 = vmatprep.subr.bf16.mxu0 %v4121_v5 }
0x1d2b   :  { %4124 = vmatpush3.bf16.msra.mxu0 %v4121_v5 }
0x1d2c   :  { %v4125_v9 = vpack.c.bf16 %v4483_v7, %v4482_v8 }
0x1d2e   :  { %4126 = vmatprep.subr.bf16.mxu0 %v4125_v9 }
0x1d2f   :  { %4128 = vmatpush3.bf16.msra.mxu0 %v4125_v9 }
0x1d32   :  { %3853 = vmatmul.mubr.msk.f32.vlgmr.msra.gmra.mrb[22].mxu0 %vm1871_vm10, %v2427_v56 }
0x1d33   :  { %3855 = vmatprep.mubr.msk.f32.mxu0 %vm1871_vm10, %v2428_v62 }
0x1d36   :  { %3856 = vmatmul.mubr.msk.f32.gmra.mrb[24].mxu0 %vm1871_vm10, %v2429_v58  ;;  %v2508_v10 = vpop.permute.xlu0 %2507 }
0x1d3a   :  { %v2513_v11 = vpop.permute.xlu1 %2512  ;;  %v2523_v19 = vpop.permute.xlu0 %2522 }
0x1d3e   :  { %v2518_v23 = vpop.permute.xlu1 %2517 }
0x1e05   :  { %v3854_v12 = vpop.f32.mrb[22].mxu0 }
0x1e06   :  { %v2645_v13 = vadd.f32 %v3854_v12, %v2513_v11  ;;  %v2639_v16 = vpop.f32.mrb[23].mxu0 }
0x1e07   :  { %v2640_v17 = vadd.f32 %v2639_v16, %v2508_v10 }
0x1e08   :  { %vm2659_vm6 = vcmp.ge.f32.partialorder %v2645_v13, 0.0  ;;  %v2663_v18 = vmul.f32 0.1, %v2645_v13 }
0x1e09   :  { %vm2658_vm7 = vcmp.ge.f32.partialorder %v2640_v17, 0.0  ;;  %v2662_v20 = vmul.f32 0.1, %v2640_v17  ;;  %v3857_v21 = vpop.f32.mrb[24].mxu0 }
0x1e0a   :  { %v2655_v24 = vadd.f32 %v3857_v21, %v2523_v19  ;;  %v2649_v25 = vpop.f32.mrb[25].mxu0  ;;  %v2667_v26 = vsel %vm2659_vm6, %v2645_v13, %v2663_v18  ;;  %v2671_v19 = vld [vmem:[#allocation4 + $0x128] sm:$0xff] }
0x1e0b   :  { %v2650_v27 = vadd.f32 %v2649_v25, %v2518_v23  ;;  %2677 = vrot.lane.b32.xlu0 %v2667_v26, %s4645_s5  ;;  %v2666_v28 = vsel %vm2658_vm7, %v2640_v17, %v2662_v20 }
0x1e0c   :  { %vm2661_vm8 = vcmp.ge.f32.partialorder %v2655_v24, 0.0  ;;  %v2665_v29 = vmul.f32 0.1, %v2655_v24  ;;  %2674 = vrot.lane.b32.xlu1 %v2666_v28, %s4645_s5  ;;  %v4486_v46 = vpack.i.bf16 %v2667_v26, %v2666_v28 }
0x1e0d   :  { %vm2660_vm9 = vcmp.ge.f32.partialorder %v2650_v27, 0.0  ;;  %v2664_v30 = vmul.f32 0.1, %v2650_v27 }
0x1e0e   :  { %v2669_v33 = vsel %vm2661_vm8, %v2655_v24, %v2665_v29  ;;  %v2672_v29 = vld [vmem:[#allocation4 + $0x130] sm:$0xff] }
0x1e0f   :  { %2683 = vrot.lane.b32.xlu0 %v2669_v33, %s4645_s5  ;;  %v2668_v42 = vsel %vm2660_vm9, %v2650_v27, %v2664_v30  ;;  %v2885_v30 = vld [vmem:[#allocation4 + $0x150] sm:$0xff] }
0x1e10   :  { %2680 = vrot.lane.b32.xlu1 %v2668_v42, %s4645_s5  ;;  %v4491_v45 = vpack.i.bf16 %v2669_v33, %v2668_v42 }
0x1e7d   :  { %v2678_v34 = vpop.permute.xlu0 %2677 }
0x1e7e   :  { %v2675_v41 = vpop.permute.xlu1 %2674  ;;  %v2679_v37 = vsel %vm2432_vm5, %v2678_v34, %v2667_v26 }
0x1e7f   :  { %2688 = vrot.lane.b32.xlu0 %v2679_v37, %s4645_s5  ;;  %v2676_v39 = vsel %vm2432_vm5, %v2675_v41, %v2666_v28 }
0x1e80   :  { %2686 = vrot.lane.b32.xlu1 %v2676_v39, %s4645_s5 }
0x1e81   :  { %v2684_v40 = vpop.permute.xlu0 %2683 }
0x1e82   :  { %v2681_v43 = vpop.permute.xlu1 %2680  ;;  %v2685_v44 = vsel %vm2432_vm5, %v2684_v40, %v2669_v33 }
0x1e83   :  { %2692 = vrot.lane.b32.xlu0 %v2685_v44, %s4645_s5  ;;  %v2682_v47 = vsel %vm2432_vm5, %v2681_v43, %v2668_v42 }
0x1e84   :  { %2690 = vrot.lane.b32.xlu1 %v2682_v47, %s4645_s5 }
0x1e87   :  { %4492 = vrot.lane.b32.xlu0 %v4491_v45, %s4669_s21 }
0x1e88   :  { %4487 = vrot.lane.b32.xlu1 %v4486_v46, %s4669_s21 }
0x1ef1   :  { %v2689_v48 = vpop.permute.xlu0 %2688 }
0x1ef2   :  { %v2695_v49 = vsel %vm2432_vm5, %v2689_v48, %v2667_v26  ;;  %v2687_v50 = vpop.permute.xlu1 %2686  ;;  %v2883_v26 = vld [vmem:[#allocation4 + $0x140] sm:$0xff] }
0x1ef3   :  { %v2703_v51 = vmul.f32 %v2695_v49, %v5037_v15  ;;  %v2694_v52 = vsel %vm2432_vm5, %v2687_v50, %v2666_v28  ;;  %v2699_v35 = vmul.f32 %v2695_v49, %v5048_v31  ;;  %v2884_v28 = vld [vmem:[#allocation4 + $0x148] sm:$0xff] }
0x1ef4   :  { %v2702_v32 = vmul.f32 %v2694_v52, %v5037_v15  ;;  %v2698_v56 = vmul.f32 %v2694_v52, %v5048_v31 }
0x1ef5   :  { %v2693_v54 = vpop.permute.xlu0 %2692 }
0x1ef6   :  { %v4496_v55 = vpack.i.bf16 %v2703_v51, %v2702_v32  ;;  %v2697_v57 = vsel %vm2432_vm5, %v2693_v54, %v2669_v33  ;;  %v2691_v58 = vpop.permute.xlu1 %2690  ;;  %v4506_v62 = vpack.i.bf16 %v2699_v35, %v2698_v56  ;;  %v2673_v33 = vld [vmem:[#allocation4 + $0x138] sm:$0xff] }
0x1ef7   :  { %v2705_v59 = vmul.f32 %v2697_v57, %v5037_v15  ;;  %v2696_v14 = vsel %vm2432_vm5, %v2691_v58, %v2668_v42  ;;  %v2701_v63 = vmul.f32 %v2697_v57, %v5048_v31  ;;  %v2886_v42 = vld [vmem:[#allocation4 + $0x158] sm:$0xff] }
0x1ef8   :  { %v2704_v60 = vmul.f32 %v2696_v14, %v5037_v15  ;;  %4497 = vrot.lane.b32.xlu1 %v4496_v55, %s4670_s22  ;;  %v2700_v2 = vmul.f32 %v2696_v14, %v5048_v31 }
0x1ef9   :  { %v4493_v5 = vpop.permute.xlu0 %4492 }
0x1efa   :  { %v4501_v0 = vpack.i.bf16 %v2705_v59, %v2704_v60  ;;  %v4488_v4 = vpop.permute.xlu1 %4487  ;;  %v4511_v6 = vpack.i.bf16 %v2701_v63, %v2700_v2 }
0x1efc   :  { %4507 = vrot.lane.b32.xlu1 %v4506_v62, %s4671_s23  ;;  %4502 = vrot.lane.b32.xlu0 %v4501_v0, %s4670_s22 }
0x1f00   :  { %4512 = vrot.lane.b32.xlu0 %v4511_v6, %s4671_s23  ;;  %4517 = vrot.lane.b32.xlu1 %v4488_v4, %s4671_s23 }
0x1f04   :  { %4522 = vrot.lane.b32.xlu0 %v4493_v5, %s4671_s23 }
0x1f6a   :  { %v4498_v15 = vpop.permute.xlu1 %4497 }
0x1f6b   :  { %4527 = vrot.lane.b32.xlu1 %v4498_v15, %s4671_s23 }
0x1f6e   :  { %v4503_v7 = vpop.permute.xlu0 %4502  ;;  %v4508_v8 = vpop.permute.xlu1 %4507 }
0x1f6f   :  { %v4510_v9 = vunpack.i.h.bf16 %v4508_v8  ;;  %v4509_v10 = vunpack.i.l.bf16 %v4508_v8  ;;  %4532 = vrot.lane.b32.xlu0 %v4503_v7, %s4671_s23  ;;  %2732 = vperm.xlu1 %4485, %v2670_v53  }
0x1f71   :  { %v4129_v31 = vpack.c.bf16 %v4510_v9, %v4509_v10 }
0x1f72   :  { %v4513_v11 = vpop.permute.xlu0 %4512  ;;  %v4518_v12 = vpop.permute.xlu1 %4517 }
0x1f73   :  { %v4515_v13 = vunpack.i.h.bf16 %v4513_v11  ;;  %v4514_v16 = vunpack.i.l.bf16 %v4513_v11  ;;  %v4520_v17 = vunpack.i.h.bf16 %v4518_v12  ;;  %v4519_v18 = vunpack.i.l.bf16 %v4518_v12  ;;  %4130 = vmatprep.subr.bf16.mxu1 %v4129_v31  ;;  %2737 = vperm.xlu0 %4484, %v2671_v19  }
0x1f74   :  { %4132 = vmatpush3.bf16.msra.mxu1 %v4129_v31  ;;  %4536 = vset.pattern.permute.xlu1 %v4663_v22 }
0x1f75   :  { %v4133_v20 = vpack.c.bf16 %v4515_v13, %v4514_v16  ;;  %v4137_v23 = vpack.c.bf16 %v4520_v17, %v4519_v18  ;;  %2989 = vperm.xlu1 %4536, %v2883_v26  }
0x1f76   :  { %v4523_v21 = vpop.permute.xlu0 %4522 }
0x1f77   :  { %v4525_v24 = vunpack.i.h.bf16 %v4523_v21  ;;  %v4524_v25 = vunpack.i.l.bf16 %v4523_v21  ;;  %4134 = vmatprep.subr.bf16.mxu1 %v4133_v20  ;;  %4537 = vset.pattern.permute.xlu0 %v4663_v22 }
0x1f78   :  { %4136 = vmatpush3.bf16.msra.mxu1 %v4133_v20  ;;  %2993 = vperm.xlu0 %4537, %v2884_v28  }
0x1f79   :  { %4138 = vmatprep.subr.bf16.mxu1 %v4137_v23  ;;  %v4141_v27 = vpack.c.bf16 %v4525_v24, %v4524_v25  ;;  %4538 = vset.pattern.permute.xlu1 %v4668_v36 }
0x1f7a   :  { %2742 = vperm.xlu1 %4538, %v2672_v29  }
0x1f7c   :  { %4140 = vmatpush3.bf16.msra.mxu1 %v4137_v23  ;;  %2997 = vperm.xlu0 %4537, %v2885_v30  }
0x1f7d   :  { %4142 = vmatprep.subr.bf16.mxu1 %v4141_v27 }
0x1f7e   :  { %2747 = vperm.xlu1 %4538, %v2673_v33  }
0x1f80   :  { %4144 = vmatpush3.bf16.msra.mxu1 %v4141_v27  ;;  %4580 = vset.pattern.permute.xlu0 %v4668_v36 }
0x1f82   :  { %4539 = vset.pattern.permute.xlu1 %v4663_v22 }
0x1f83   :  { %3001 = vperm.xlu1 %4539, %v2886_v42  }
0x1f87   :  { %4581 = vset.pattern.permute.xlu1 %v4668_v36 }
0x1fdd   :  { %v4528_v34 = vpop.permute.xlu1 %4527 }
0x1fde   :  { %v4530_v41 = vunpack.i.h.bf16 %v4528_v34  ;;  %v4529_v37 = vunpack.i.l.bf16 %v4528_v34 }
0x1fe0   :  { %v4145_v39 = vpack.c.bf16 %v4530_v41, %v4529_v37  ;;  %v3072_v37 = vld [vmem:[#allocation4 + $0x160] sm:$0xff] }
0x1fe1   :  { %v4533_v40 = vpop.permute.xlu0 %4532  ;;  %3926 = vmatprep.mubr.msk.f32.mxu0 %vm1871_vm10, %v3072_v37 }
0x1fe2   :  { %v4535_v43 = vunpack.i.h.bf16 %v4533_v40  ;;  %v4534_v44 = vunpack.i.l.bf16 %v4533_v40  ;;  %4146 = vmatprep.subr.bf16.mxu1 %v4145_v39  ;;  %v3075_v40 = vld [vmem:[#allocation4 + $0x178] sm:$0xff] }
0x1fe3   :  { %4148 = vmatpush3.bf16.msra.mxu1 %v4145_v39  ;;  %v3073_v39 = vld [vmem:[#allocation4 + $0x168] sm:$0xff] }
0x1fe4   :  { %v4149_v47 = vpack.c.bf16 %v4535_v43, %v4534_v44  ;;  %v3074_v43 = vld [vmem:[#allocation4 + $0x170] sm:$0xff] }
0x1fe6   :  { %4150 = vmatprep.subr.bf16.mxu1 %v4149_v47 }
0x1fe7   :  { %4152 = vmatpush3.bf16.msra.mxu1 %v4149_v47 }
0x1fe8   :  { %4154 = vmatprep.subr.bf16.mxu1 %v5017_v38 }
0x1fea   :  { %3883 = vmatmul.mubr.msk.f32.vlgmr.msra.gmra.mrb[22].mxu1 %vm1871_vm10, %v2671_v19 }
0x1feb   :  { %4156 = vmatpush3.bf16.msra.mxu1 %v5017_v38  ;;  %3885 = vmatprep.mubr.msk.f32.mxu1 %vm1871_vm10, %v2672_v29 }
0x1fec   :  { %4158 = vmatprep.subr.bf16.mxu1 %v5021_v61 }
0x1fee   :  { %3886 = vmatmul.mubr.msk.f32.gmra.mrb[24].mxu1 %vm1871_vm10, %v2673_v33  ;;  %v2733_v36 = vpop.permute.xlu1 %2732 }
0x1fef   :  { %4160 = vmatpush3.bf16.msra.mxu1 %v5021_v61  ;;  %3896 = vmatprep.mubr.msk.f32.mxu1 %vm1291_vm3, %v2883_v26 }
0x1ff0   :  { %4185 = vmatprep.subr.bf16.mxu1 %v4646_v1 }
0x1ff2   :  { %3897 = vmatmul.mubr.msk.f32.vlgmr.msra.gmra.mrb[22].mxu1 %vm1291_vm3, %v2884_v28  ;;  %v2738_v46 = vpop.permute.xlu0 %2737 }
0x1ff3   :  { %3899 = vmatprep.mubr.msk.f32.mxu1 %vm1291_vm3, %v2885_v30 }
0x1ff4   :  { %v2990_v38 = vpop.permute.xlu1 %2989 }
0x1ff6   :  { %3900 = vmatmul.mubr.msk.f32.gmra.mrb[24].mxu1 %vm1291_vm3, %v2886_v42 }
0x1ff7   :  { %3940 = vmatprep.mubr.msk.f32.mxu1 %vm4647_vm1, %v4648_v3  ;;  %v2994_v61 = vpop.permute.xlu0 %2993 }
0x1ff9   :  { %v2743_v45 = vpop.permute.xlu1 %2742 }
0x1ffb   :  { %v2998_v14 = vpop.permute.xlu0 %2997 }
0x1ffd   :  { %v2748_v48 = vpop.permute.xlu1 %2747 }
0x2002   :  { %v3002_v35 = vpop.permute.xlu1 %3001 }
0x20c5   :  { %v3898_v49 = vpop.f32.mrb[22].mxu1 }
0x20c6   :  { %v4201_v50 = vadd.f32 %v3898_v49, %v2738_v46  ;;  %v2965_v51 = vpop.f32.mrb[23].mxu1 }
0x20c7   :  { %v4202_v52 = vadd.f32 %v2965_v51, %v2733_v36 }
0x20c8   :  { %v3005_v53 = vadd.f32 %v4201_v50, %v2994_v61 }
0x20c9   :  { %v3004_v32 = vadd.f32 %v4202_v52, %v2990_v38  ;;  %v3901_v54 = vpop.f32.mrb[24].mxu1 }
0x20ca   :  { %vm3009_vm11 = vcmp.ge.f32.partialorder %v3005_v53, 0.0  ;;  %v3013_v55 = vmul.f32 0.1, %v3005_v53  ;;  %v4203_v56 = vadd.f32 %v3901_v54, %v2748_v48  ;;  %v2975_v57 = vpop.f32.mrb[25].mxu1 }
0x20cb   :  { %vm3008_vm12 = vcmp.ge.f32.partialorder %v3004_v32, 0.0  ;;  %v3012_v3 = vmul.f32 0.1, %v3004_v32  ;;  %v4204_v58 = vadd.f32 %v2975_v57, %v2743_v45 }
0x20cc   :  { %v3017_v59 = vsel %vm3009_vm11, %v3005_v53, %v3013_v55  ;;  %v3007_v60 = vadd.f32 %v4203_v56, %v3002_v35  ;;  %v3076_v35 = vld [vmem:[#allocation4 + $0x180] sm:$0x1f] }
0x20cd   :  { %v3016_v62 = vsel %vm3008_vm12, %v3004_v32, %v3012_v3  ;;  %v3006_v63 = vadd.f32 %v4204_v58, %v2998_v14 }
0x20ce   :  { %vm3011_vm1 = vcmp.ge.f32.partialorder %v3007_v60, 0.0  ;;  %v3015_v0 = vmul.f32 0.1, %v3007_v60  ;;  %v4540_v2 = vpack.i.bf16 %v3017_v59, %v3016_v62  ;;  %v4161_v4 = vpack.c.bf16 %v3017_v59, %v3016_v62 }
0x20cf   :  { %vm3010_vm13 = vcmp.ge.f32.partialorder %v3006_v63, 0.0  ;;  %v3014_v5 = vmul.f32 0.1, %v3006_v63 }
0x20d0   :  { %v3019_v6 = vsel %vm3011_vm1, %v3007_v60, %v3015_v0  ;;  %4541 = vrot.lane.b32.xlu0 %v4540_v2, %s4645_s5  ;;  %4162 = vmatprep.subr.bf16.mxu0 %v4161_v4 }
0x20d1   :  { %v3018_v15 = vsel %vm3010_vm13, %v3006_v63, %v3014_v5  ;;  %4164 = vmatpush3.bf16.msra.mxu0 %v4161_v4 }
0x20d2   :  { %v4545_v7 = vpack.i.bf16 %v3019_v6, %v3018_v15  ;;  %v4165_v8 = vpack.c.bf16 %v3019_v6, %v3018_v15 }
0x20d4   :  { %4546 = vrot.lane.b32.xlu1 %v4545_v7, %s4645_s5  ;;  %4166 = vmatprep.subr.bf16.mxu0 %v4165_v8 }
0x20d5   :  { %4168 = vmatpush3.bf16.msra.mxu0 %v4165_v8 }
0x2142   :  { %v4542_v9 = vpop.permute.xlu0 %4541 }
0x2143   :  { %v4544_v10 = vunpack.i.h.bf16 %v4542_v9  ;;  %v4543_v31 = vunpack.i.l.bf16 %v4542_v9 }
0x2145   :  { %v3022_v11 = vsel %vm2432_vm5, %v4543_v31, %v3016_v62  ;;  %v3025_v12 = vsel %vm2432_vm5, %v4544_v10, %v3017_v59 }
0x2146   :  { %v4547_v13 = vpop.permute.xlu1 %4546  ;;  %v4550_v16 = vpack.i.bf16 %v3025_v12, %v3022_v11 }
0x2147   :  { %v4549_v17 = vunpack.i.h.bf16 %v4547_v13  ;;  %v4548_v18 = vunpack.i.l.bf16 %v4547_v13 }
0x2148   :  { %4551 = vrot.lane.b32.xlu0 %v4550_v16, %s4645_s5 }
0x2149   :  { %v3028_v19 = vsel %vm2432_vm5, %v4548_v18, %v3018_v15  ;;  %v3031_v20 = vsel %vm2432_vm5, %v4549_v17, %v3019_v6 }
0x214a   :  { %v4555_v21 = vpack.i.bf16 %v3031_v20, %v3028_v19 }
0x214c   :  { %4556 = vrot.lane.b32.xlu1 %v4555_v21, %s4645_s5 }
0x21ba   :  { %v4552_v23 = vpop.permute.xlu0 %4551 }
0x21bb   :  { %v4554_v24 = vunpack.i.h.bf16 %v4552_v23  ;;  %v4553_v25 = vunpack.i.l.bf16 %v4552_v23 }
0x21bd   :  { %v3041_v26 = vsel %vm2432_vm5, %v4554_v24, %v3017_v59  ;;  %v3040_v27 = vsel %vm2432_vm5, %v4553_v25, %v3016_v62 }
0x21be   :  { %v4560_v28 = vpack.i.bf16 %v3041_v26, %v3040_v27  ;;  %v4557_v29 = vpop.permute.xlu1 %4556 }
0x21bf   :  { %v4559_v30 = vunpack.i.h.bf16 %v4557_v29  ;;  %v4558_v33 = vunpack.i.l.bf16 %v4557_v29 }
0x21c0   :  { %4561 = vrot.lane.b32.xlu0 %v4560_v28, %s4650_s1 }
0x21c1   :  { %v3043_v42 = vsel %vm2432_vm5, %v4559_v30, %v3019_v6  ;;  %v3042_v34 = vsel %vm2432_vm5, %v4558_v33, %v3018_v15 }
0x21c2   :  { %v4565_v41 = vpack.i.bf16 %v3043_v42, %v3042_v34 }
0x21c4   :  { %4571 = vrot.lane.b32.xlu0 %v4560_v28, %s4672_s24  ;;  %4566 = vrot.lane.b32.xlu1 %v4565_v41, %s4650_s1 }
0x21c8   :  { %4576 = vrot.lane.b32.xlu1 %v4565_v41, %s4672_s24  ;;  %3079 = vperm.xlu0 %4580, %v3072_v37  }
0x21cc   :  { %3084 = vperm.xlu1 %4581, %v3073_v39   ;;  %3094 = vperm.xlu0 %4580, %v3075_v40  }
0x21d0   :  { %3089 = vperm.xlu1 %4581, %v3074_v43   ;;  %4583 = vset.pattern.permute.xlu0 %v4663_v22 }
0x21d4   :  { %4582 = vset.pattern.permute.xlu1 %v4663_v22 }
0x21d5   :  { %3192 = vperm.xlu1 %4582, %v3076_v35  }
0x2232   :  { %v4562_v44 = vpop.permute.xlu0 %4561 }
0x2233   :  { %v4564_v47 = vunpack.i.h.bf16 %v4562_v44  ;;  %v4563_v36 = vunpack.i.l.bf16 %v4562_v44 }
0x2235   :  { %v4169_v38 = vpack.c.bf16 %v4564_v47, %v4563_v36 }
0x2236   :  { %v4572_v45 = vpop.permute.xlu0 %4571  ;;  %v4567_v46 = vpop.permute.xlu1 %4566 }
0x2237   :  { %v4574_v48 = vunpack.i.h.bf16 %v4572_v45  ;;  %v4573_v49 = vunpack.i.l.bf16 %v4572_v45  ;;  %v4569_v61 = vunpack.i.h.bf16 %v4567_v46  ;;  %v4568_v50 = vunpack.i.l.bf16 %v4567_v46  ;;  %4170 = vmatprep.subr.bf16.mxu0 %v4169_v38 }
0x2238   :  { %4172 = vmatpush3.bf16.msra.mxu0 %v4169_v38 }
0x2239   :  { %v4173_v51 = vpack.c.bf16 %v4569_v61, %v4568_v50  ;;  %v4177_v53 = vpack.c.bf16 %v4574_v48, %v4573_v49 }
0x223a   :  { %v4577_v52 = vpop.permute.xlu1 %4576 }
0x223b   :  { %v4579_v32 = vunpack.i.h.bf16 %v4577_v52  ;;  %v4578_v54 = vunpack.i.l.bf16 %v4577_v52  ;;  %4174 = vmatprep.subr.bf16.mxu0 %v4173_v51 }
0x223c   :  { %4176 = vmatpush3.bf16.msra.mxu0 %v4173_v51 }
0x223d   :  { %4178 = vmatprep.subr.bf16.mxu0 %v4177_v53  ;;  %v4181_v22 = vpack.c.bf16 %v4579_v32, %v4578_v54 }
0x2240   :  { %4180 = vmatpush3.bf16.msra.mxu0 %v4177_v53 }
0x2241   :  { %4182 = vmatprep.subr.bf16.mxu0 %v4181_v22 }
0x2244   :  { %4184 = vmatpush3.bf16.msra.mxu0 %v4181_v22 }
0x2247   :  { %3927 = vmatmul.mubr.msk.f32.vlgmr.msra.gmra.mrb[26].mxu0 %vm1871_vm10, %v3073_v39  ;;  %v3080_v55 = vpop.permute.xlu0 %3079 }
0x2248   :  { %3929 = vmatprep.mubr.msk.f32.mxu0 %vm1871_vm10, %v3074_v43 }
0x224b   :  { %3930 = vmatmul.mubr.msk.f32.gmra.mrb[28].mxu0 %vm1871_vm10, %v3075_v40  ;;  %v3085_v56 = vpop.permute.xlu1 %3084  ;;  %v3095_v14 = vpop.permute.xlu0 %3094  ;;  %vm3271_vm10 = vcmask 15360  }
0x224f   :  { %v3090_v63 = vpop.permute.xlu1 %3089 }
0x2254   :  { %v3193_v6 = vpop.permute.xlu1 %3192 }
0x231a   :  { %v3928_v57 = vpop.f32.mrb[26].mxu0 }
0x231b   :  { %v3177_v3 = vadd.f32 %v3928_v57, %v3085_v56  ;;  %v3171_v58 = vpop.f32.mrb[27].mxu0 }
0x231c   :  { %v3172_v59 = vadd.f32 %v3171_v58, %v3080_v55 }
0x231e   :  { %v4186_v60 = vpack.c.bf16 %v3177_v3, %v3172_v59  ;;  %v3931_v62 = vpop.f32.mrb[28].mxu0 }
0x231f   :  { %v3187_v0 = vadd.f32 %v3931_v62, %v3095_v14  ;;  %v3181_v2 = vpop.f32.mrb[29].mxu0 }
0x2320   :  { %v3182_v4 = vadd.f32 %v3181_v2, %v3090_v63  ;;  %4187 = vmatpush3.bf16.msra.mxu1 %v4186_v60 }
0x2321   :  { %4188 = vmatprep.subr.bf16.mxu1 %v4646_v1 }
0x2322   :  { %v4189_v5 = vpack.c.bf16 %v3187_v0, %v3182_v4 }
0x2324   :  { %4190 = vmatpush3.bf16.msra.mxu1 %v4189_v5 }
0x2327   :  { %3941 = vmatmul.mubr.msk.f32.vlgmr.msra.gmra.mrb[26].mxu1 %vm1291_vm3, %v3076_v35 }
0x23fa   :  { %v3263_v15 = vpop.f32.mrb[26].mxu1 }
0x23fb   :  { %v3264_v7 = vadd.f32 %v3263_v15, %v3193_v6  ;;  %v3942_v8 = vpop.f32.mrb[27].mxu1 }
0x23fd   :  { %3268 = vrot.lane.b32.xlu0 %v3264_v7, %s4672_s24 }
0x246f   :  { %v3269_v9 = vpop.permute.xlu0 %3268 }
0x2470   :  { %v3272_v10 = vsel %vm3271_vm10, %v3264_v7, %v3269_v9 }
0x2471   :  { %3274 = vst.msk [vmem:[%s5150_s2] sm:$0x1f] %vm3273_vm14, %v3272_v10 }
0x2472   :  { %3279 = vsyncpa [#allocation3], 1 }
0x2473   :  { %3280 = vsyncpa [#allocation5], 1 }

</bundles_post_ra>
